<compile_context>
chip_gen: v5e
topology: v5e:2x2
jax: 0.10.0
libtpu: 0.0.40
codegen_flags: <defaults>
</compile_context>

<pallas_src>
import functools

import jax
import jax.numpy as jnp
from jax import lax
from jax.experimental import pallas as pl
from jax.experimental.pallas import tpu as pltpu


def _crf_kernel(feats_ref, logits_ref, w_ref, out_ref, *, iteration):
    # feats_ref : (Bt, N, E)  VMEM
    # logits_ref: (Bt, 1, N)  VMEM  (lane-dense: N on the lane axis)
    # w_ref     : (N, N)      VMEM  (pre-symmetrized W)
    # out_ref   : (Bt, 1, N)  VMEM
    feats = feats_ref[...]                       # (Bt, N, E) f32
    logits0 = logits_ref[...]                    # (Bt, 1, N) f32
    w_sym = w_ref[...]                           # (N, N)     f32

    # cosine similarity = (f/|f|)(f/|f|)^T : normalize first, then ONE batched
    # MXU contraction over E.  No rank-1 norm matmul, no NxN divide, no explicit
    # transpose (the einsum contracts the last dims natively).
    # NOTE: like the reference module, no eps — all-zero feature rows would NaN.
    inv_norm = lax.rsqrt(jnp.sum(feats * feats, axis=-1, keepdims=True))  # (Bt,N,1)
    fn = feats * inv_norm                                                  # (Bt,N,E)
    pairwise_sim = jnp.einsum('bie,bje->bij', fn, fn,
                              preferred_element_type=jnp.float32)          # (Bt,N,N)
    pp = pairwise_sim * w_sym[None, :, :]                                  # (Bt,N,N)

    unary = logits0                                                        # (Bt,1,N)

    def body(_, lg):                                                       # lg (Bt,1,N)
        # 2*sigmoid(x) - 1 == tanh(x/2): one EUP op on the critical path.
        t = jnp.tanh(0.5 * lg)                                             # (Bt,1,N)
        # pe[b,0,i] = sum_j t[b,0,j] * pp[b,i,j]   (batched MXU matvec)
        pe = jnp.einsum('bqj,bij->bqi', t, pp,
                        preferred_element_type=jnp.float32)                # (Bt,1,N)
        return unary + pe

    # iteration is static -> unroll so the LLO scheduler can overlap EUP/MXU work
    # across consecutive mean-field steps.
    out_ref[...] = lax.fori_loop(0, iteration, body, logits0, unroll=True)


def crf_forward(feats, logits, W, *, iteration=10, block_b=8):
    """Pallas CRF forward. feats [B,N,E] f32, logits [B,N,1] f32, W [1,N,N] f32.

    Returns logits after `iteration` mean-field steps, shape [B,N,1].
    """
    B, N, E = feats.shape
    assert logits.shape == (B, N, 1)
    assert W.shape == (1, N, N)

    # Hoisted once in the wrapper (pure JAX): symmetrize W and make the logits
    # lane-dense (N on the last/lane axis) so the kernel's output stores are
    # unmasked slabs instead of last-dim-1 masked partial stores.
    w_sym = (0.5 * (W + jnp.transpose(W, (0, 2, 1))))[0]       # (N, N)
    logits_t = jnp.transpose(logits, (0, 2, 1))                # (B, 1, N)
    feats = feats.astype(jnp.float32)
    logits_t = logits_t.astype(jnp.float32)
    w_sym = w_sym.astype(jnp.float32)

    # Batch several batch elements per grid step to amortize per-step overhead.
    bt = max(1, min(block_b, B))
    pad = (-B) % bt
    if pad:
        # Pad with non-zero features so the (eps-free) cosine norm stays finite;
        # padded rows are sliced off below.
        feats = jnp.concatenate(
            [feats, jnp.ones((pad, N, E), feats.dtype)], axis=0)
        logits_t = jnp.concatenate(
            [logits_t, jnp.zeros((pad, 1, N), logits_t.dtype)], axis=0)
    bp = B + pad

    kernel = functools.partial(_crf_kernel, iteration=iteration)

    # NOTE: for very large N (roughly N > ~2000 on v7x), the (Bt,N,N) pairwise
    # potential no longer fits VMEM and the N columns would need to be tiled with
    # a per-column-tile accumulation; not needed at the sizes used here.
    out_t = pl.pallas_call(
        kernel,
        out_shape=jax.ShapeDtypeStruct((bp, 1, N), jnp.float32),
        grid_spec=pltpu.PrefetchScalarGridSpec(
            num_scalar_prefetch=0,
            grid=(bp // bt,),
            in_specs=[
                pl.BlockSpec((bt, N, E), lambda b: (b, 0, 0)),
                pl.BlockSpec((bt, 1, N), lambda b: (b, 0, 0)),
                pl.BlockSpec((N, N), lambda b: (0, 0)),   # shared, constant block
            ],
            out_specs=pl.BlockSpec((bt, 1, N), lambda b: (b, 0, 0)),
        ),
        compiler_params=pltpu.CompilerParams(
            dimension_semantics=("parallel",)),
    )(feats, logits_t, w_sym)

    return jnp.transpose(out_t[:B], (0, 2, 1))                 # (B, N, 1)


def crf_reference(feats, logits, W, *, iteration=10):
    """Pure-JAX reference mirroring the PyTorch module (num_classes=1)."""
    feats_norm = jnp.linalg.norm(feats, axis=2, keepdims=True)               # [B,N,1]
    pairwise_norm = jnp.einsum('bik,bjk->bij', feats_norm, feats_norm)       # [B,N,N]
    pairwise_dot = jnp.einsum('bie,bje->bij', feats, feats)                  # [B,N,N]
    pairwise_sim = pairwise_dot / pairwise_norm
    W_sym = (W + jnp.transpose(W, (0, 2, 1))) / 2.0
    pairwise_potential = pairwise_sim * W_sym                                # [B,N,N]
    unary = logits
    out = logits
    for _ in range(iteration):
        probs = jnp.transpose(jax.nn.sigmoid(out), (0, 2, 1))                # [B,1,N]
        pe = jnp.sum(probs * pairwise_potential
                     - (1.0 - probs) * pairwise_potential,
                     axis=2, keepdims=True)                                  # [B,N,1]
        out = unary + pe
    return out


# TODO(synk): the num_classes > 1 branch of the PyTorch module is not implemented
# (module default is num_classes=1, which is the path reproduced here).

if __name__ == "__main__":
    B, N, E = 16, 16, 32          # batch, num_nodes (grid patches), embedding
    ITER = 10

    key = jax.random.PRNGKey(0)
    k_f, k_l, k_w = jax.random.split(key, 3)
    feats = jax.random.normal(k_f, (B, N, E), dtype=jnp.float32)
    logits = jax.random.normal(k_l, (B, N, 1), dtype=jnp.float32)
    # Module __init__ uses zeros for W; use small deterministic values here so
    # the pairwise-potential path is actually exercised.
    W = 0.05 * jax.random.normal(k_w, (1, N, N), dtype=jnp.float32)

    out = crf_forward(feats, logits, W, iteration=ITER, block_b=8)
    out = jax.block_until_ready(out)

    ref = crf_reference(feats, logits, W, iteration=ITER)
    assert out.shape == (B, N, 1)
    assert jnp.allclose(out, ref, atol=1e-4, rtol=1e-4), (
        f"max abs diff {jnp.max(jnp.abs(out - ref))}")

    print("KERNEL_OK")
</pallas_src>

<mosaic_0001>
module attributes {stable_mosaic.version = 11 : i64} {
  func.func @_crf_kernel(%arg0: i32, %arg1: memref<8x16x32xf32, #tpu.memory_space<vmem>>, %arg2: memref<8x1x16xf32, #tpu.memory_space<vmem>>, %arg3: memref<16x16xf32, #tpu.memory_space<vmem>>, %arg4: memref<8x1x16xf32, #tpu.memory_space<vmem>>) attributes {dimension_semantics = [#tpu.dimension_semantics<parallel>], iteration_bounds = array<i64: 2>, scalar_prefetch = 0 : i64, scratch_operands = 0 : i64, tpu.core_type = #tpu.core_type<tc>, window_params = [{transform_indices = @transform_0, window_bounds = array<i64: 8, 16, 32>}, {transform_indices = @transform_1, window_bounds = array<i64: 8, 1, 16>}, {pipeline_mode = #tpu.pipeline_mode<synchronous>, transform_indices = @transform_2, window_bounds = array<i64: 16, 16>}, {transform_indices = @transform_3, window_bounds = array<i64: 8, 1, 16>}]} {
    %c0 = arith.constant 0 : index
    %c0_0 = arith.constant 0 : index
    %c0_1 = arith.constant 0 : index
    %0 = vector.load %arg1[%c0, %c0_0, %c0_1] : memref<8x16x32xf32, #tpu.memory_space<vmem>>, vector<8x16x32xf32>
    %c0_2 = arith.constant 0 : index
    %c0_3 = arith.constant 0 : index
    %c0_4 = arith.constant 0 : index
    %1 = vector.load %arg2[%c0_2, %c0_3, %c0_4] : memref<8x1x16xf32, #tpu.memory_space<vmem>>, vector<8x1x16xf32>
    %c0_5 = arith.constant 0 : index
    %c0_6 = arith.constant 0 : index
    %2 = vector.load %arg3[%c0_5, %c0_6] : memref<16x16xf32, #tpu.memory_space<vmem>>, vector<16x16xf32>
    %3 = arith.mulf %0, %0 : vector<8x16x32xf32>
    %cst = arith.constant dense<0.000000e+00> : vector<8x16xf32>
    %4 = vector.multi_reduction <add>, %3, %cst [2] : vector<8x16x32xf32> to vector<8x16xf32>
    %5 = vector.shape_cast %4 : vector<8x16xf32> to vector<8x16x1xf32>
    %6 = math.rsqrt %5 : vector<8x16x1xf32>
    %7 = vector.broadcast %6 : vector<8x16x1xf32> to vector<8x16x32xf32>
    %8 = arith.mulf %0, %7 : vector<8x16x32xf32>
    "tpu.trace_start"() <{level = 10 : i32, message = "bie,bje->bij"}> : () -> ()
    %cst_7 = arith.constant dense<0.000000e+00> : vector<8x16x16xf32>
    %9 = tpu.matmul %8, %8, %cst_7 {dimension_numbers = #tpu.dot_dimension_numbers<[2], [2], [1], [1], [0, 0, 0, 1, 1, 1], [0], [0]>} : vector<8x16x32xf32>, vector<8x16x32xf32>, vector<8x16x16xf32> -> vector<8x16x16xf32>
    "tpu.trace_stop"() : () -> ()
    %10 = vector.shape_cast %2 : vector<16x16xf32> to vector<1x16x16xf32>
    %11 = vector.broadcast %10 : vector<1x16x16xf32> to vector<8x16x16xf32>
    %12 = arith.mulf %9, %11 : vector<8x16x16xf32>
    %c0_i32 = arith.constant 0 : i32
    %cst_8 = arith.constant 5.000000e-01 : f32
    %13 = vector.broadcast %cst_8 : f32 to vector<8x1x16xf32>
    %14 = arith.mulf %13, %1 : vector<8x1x16xf32>
    %15 = math.tanh %14 : vector<8x1x16xf32>
    "tpu.trace_start"() <{level = 10 : i32, message = "bqj,bij->bqi"}> : () -> ()
    %cst_9 = arith.constant dense<0.000000e+00> : vector<8x1x16xf32>
    %16 = tpu.matmul %15, %12, %cst_9 {dimension_numbers = #tpu.dot_dimension_numbers<[2], [2], [1], [1], [0, 0, 0, 1, 1, 1], [0], [0]>} : vector<8x1x16xf32>, vector<8x16x16xf32>, vector<8x1x16xf32> -> vector<8x1x16xf32>
    "tpu.trace_stop"() : () -> ()
    %17 = arith.addf %1, %16 : vector<8x1x16xf32>
    %c1_i32 = arith.constant 1 : i32
    %cst_10 = arith.constant 5.000000e-01 : f32
    %18 = vector.broadcast %cst_10 : f32 to vector<8x1x16xf32>
    %19 = arith.mulf %18, %17 : vector<8x1x16xf32>
    %20 = math.tanh %19 : vector<8x1x16xf32>
    "tpu.trace_start"() <{level = 10 : i32, message = "bqj,bij->bqi"}> : () -> ()
    %cst_11 = arith.constant dense<0.000000e+00> : vector<8x1x16xf32>
    %21 = tpu.matmul %20, %12, %cst_11 {dimension_numbers = #tpu.dot_dimension_numbers<[2], [2], [1], [1], [0, 0, 0, 1, 1, 1], [0], [0]>} : vector<8x1x16xf32>, vector<8x16x16xf32>, vector<8x1x16xf32> -> vector<8x1x16xf32>
    "tpu.trace_stop"() : () -> ()
    %22 = arith.addf %1, %21 : vector<8x1x16xf32>
    %c2_i32 = arith.constant 2 : i32
    %cst_12 = arith.constant 5.000000e-01 : f32
    %23 = vector.broadcast %cst_12 : f32 to vector<8x1x16xf32>
    %24 = arith.mulf %23, %22 : vector<8x1x16xf32>
    %25 = math.tanh %24 : vector<8x1x16xf32>
    "tpu.trace_start"() <{level = 10 : i32, message = "bqj,bij->bqi"}> : () -> ()
    %cst_13 = arith.constant dense<0.000000e+00> : vector<8x1x16xf32>
    %26 = tpu.matmul %25, %12, %cst_13 {dimension_numbers = #tpu.dot_dimension_numbers<[2], [2], [1], [1], [0, 0, 0, 1, 1, 1], [0], [0]>} : vector<8x1x16xf32>, vector<8x16x16xf32>, vector<8x1x16xf32> -> vector<8x1x16xf32>
    "tpu.trace_stop"() : () -> ()
    %27 = arith.addf %1, %26 : vector<8x1x16xf32>
    %c3_i32 = arith.constant 3 : i32
    %cst_14 = arith.constant 5.000000e-01 : f32
    %28 = vector.broadcast %cst_14 : f32 to vector<8x1x16xf32>
    %29 = arith.mulf %28, %27 : vector<8x1x16xf32>
    %30 = math.tanh %29 : vector<8x1x16xf32>
    "tpu.trace_start"() <{level = 10 : i32, message = "bqj,bij->bqi"}> : () -> ()
    %cst_15 = arith.constant dense<0.000000e+00> : vector<8x1x16xf32>
    %31 = tpu.matmul %30, %12, %cst_15 {dimension_numbers = #tpu.dot_dimension_numbers<[2], [2], [1], [1], [0, 0, 0, 1, 1, 1], [0], [0]>} : vector<8x1x16xf32>, vector<8x16x16xf32>, vector<8x1x16xf32> -> vector<8x1x16xf32>
    "tpu.trace_stop"() : () -> ()
    %32 = arith.addf %1, %31 : vector<8x1x16xf32>
    %c4_i32 = arith.constant 4 : i32
    %cst_16 = arith.constant 5.000000e-01 : f32
    %33 = vector.broadcast %cst_16 : f32 to vector<8x1x16xf32>
    %34 = arith.mulf %33, %32 : vector<8x1x16xf32>
    %35 = math.tanh %34 : vector<8x1x16xf32>
    "tpu.trace_start"() <{level = 10 : i32, message = "bqj,bij->bqi"}> : () -> ()
    %cst_17 = arith.constant dense<0.000000e+00> : vector<8x1x16xf32>
    %36 = tpu.matmul %35, %12, %cst_17 {dimension_numbers = #tpu.dot_dimension_numbers<[2], [2], [1], [1], [0, 0, 0, 1, 1, 1], [0], [0]>} : vector<8x1x16xf32>, vector<8x16x16xf32>, vector<8x1x16xf32> -> vector<8x1x16xf32>
    "tpu.trace_stop"() : () -> ()
    %37 = arith.addf %1, %36 : vector<8x1x16xf32>
    %c5_i32 = arith.constant 5 : i32
    %cst_18 = arith.constant 5.000000e-01 : f32
    %38 = vector.broadcast %cst_18 : f32 to vector<8x1x16xf32>
    %39 = arith.mulf %38, %37 : vector<8x1x16xf32>
    %40 = math.tanh %39 : vector<8x1x16xf32>
    "tpu.trace_start"() <{level = 10 : i32, message = "bqj,bij->bqi"}> : () -> ()
    %cst_19 = arith.constant dense<0.000000e+00> : vector<8x1x16xf32>
    %41 = tpu.matmul %40, %12, %cst_19 {dimension_numbers = #tpu.dot_dimension_numbers<[2], [2], [1], [1], [0, 0, 0, 1, 1, 1], [0], [0]>} : vector<8x1x16xf32>, vector<8x16x16xf32>, vector<8x1x16xf32> -> vector<8x1x16xf32>
    "tpu.trace_stop"() : () -> ()
    %42 = arith.addf %1, %41 : vector<8x1x16xf32>
    %c6_i32 = arith.constant 6 : i32
    %cst_20 = arith.constant 5.000000e-01 : f32
    %43 = vector.broadcast %cst_20 : f32 to vector<8x1x16xf32>
    %44 = arith.mulf %43, %42 : vector<8x1x16xf32>
    %45 = math.tanh %44 : vector<8x1x16xf32>
    "tpu.trace_start"() <{level = 10 : i32, message = "bqj,bij->bqi"}> : () -> ()
    %cst_21 = arith.constant dense<0.000000e+00> : vector<8x1x16xf32>
    %46 = tpu.matmul %45, %12, %cst_21 {dimension_numbers = #tpu.dot_dimension_numbers<[2], [2], [1], [1], [0, 0, 0, 1, 1, 1], [0], [0]>} : vector<8x1x16xf32>, vector<8x16x16xf32>, vector<8x1x16xf32> -> vector<8x1x16xf32>
    "tpu.trace_stop"() : () -> ()
    %47 = arith.addf %1, %46 : vector<8x1x16xf32>
    %c7_i32 = arith.constant 7 : i32
    %cst_22 = arith.constant 5.000000e-01 : f32
    %48 = vector.broadcast %cst_22 : f32 to vector<8x1x16xf32>
    %49 = arith.mulf %48, %47 : vector<8x1x16xf32>
    %50 = math.tanh %49 : vector<8x1x16xf32>
    "tpu.trace_start"() <{level = 10 : i32, message = "bqj,bij->bqi"}> : () -> ()
    %cst_23 = arith.constant dense<0.000000e+00> : vector<8x1x16xf32>
    %51 = tpu.matmul %50, %12, %cst_23 {dimension_numbers = #tpu.dot_dimension_numbers<[2], [2], [1], [1], [0, 0, 0, 1, 1, 1], [0], [0]>} : vector<8x1x16xf32>, vector<8x16x16xf32>, vector<8x1x16xf32> -> vector<8x1x16xf32>
    "tpu.trace_stop"() : () -> ()
    %52 = arith.addf %1, %51 : vector<8x1x16xf32>
    %c8_i32 = arith.constant 8 : i32
    %cst_24 = arith.constant 5.000000e-01 : f32
    %53 = vector.broadcast %cst_24 : f32 to vector<8x1x16xf32>
    %54 = arith.mulf %53, %52 : vector<8x1x16xf32>
    %55 = math.tanh %54 : vector<8x1x16xf32>
    "tpu.trace_start"() <{level = 10 : i32, message = "bqj,bij->bqi"}> : () -> ()
    %cst_25 = arith.constant dense<0.000000e+00> : vector<8x1x16xf32>
    %56 = tpu.matmul %55, %12, %cst_25 {dimension_numbers = #tpu.dot_dimension_numbers<[2], [2], [1], [1], [0, 0, 0, 1, 1, 1], [0], [0]>} : vector<8x1x16xf32>, vector<8x16x16xf32>, vector<8x1x16xf32> -> vector<8x1x16xf32>
    "tpu.trace_stop"() : () -> ()
    %57 = arith.addf %1, %56 : vector<8x1x16xf32>
    %c9_i32 = arith.constant 9 : i32
    %cst_26 = arith.constant 5.000000e-01 : f32
    %58 = vector.broadcast %cst_26 : f32 to vector<8x1x16xf32>
    %59 = arith.mulf %58, %57 : vector<8x1x16xf32>
    %60 = math.tanh %59 : vector<8x1x16xf32>
    "tpu.trace_start"() <{level = 10 : i32, message = "bqj,bij->bqi"}> : () -> ()
    %cst_27 = arith.constant dense<0.000000e+00> : vector<8x1x16xf32>
    %61 = tpu.matmul %60, %12, %cst_27 {dimension_numbers = #tpu.dot_dimension_numbers<[2], [2], [1], [1], [0, 0, 0, 1, 1, 1], [0], [0]>} : vector<8x1x16xf32>, vector<8x16x16xf32>, vector<8x1x16xf32> -> vector<8x1x16xf32>
    "tpu.trace_stop"() : () -> ()
    %62 = arith.addf %1, %61 : vector<8x1x16xf32>
    %c0_28 = arith.constant 0 : index
    %c0_29 = arith.constant 0 : index
    %c0_30 = arith.constant 0 : index
    %63 = vector.load %arg4[%c0_28, %c0_29, %c0_30] : memref<8x1x16xf32, #tpu.memory_space<vmem>>, vector<8x1x16xf32>
    tpu.vector_store %arg4[%c0_28, %c0_29, %c0_30], %62 {strides = array<i32>} : memref<8x1x16xf32, #tpu.memory_space<vmem>>, vector<8x1x16xf32>,
    return
  }
  func.func @transform_0(%arg0: i32) -> (i32, i32, i32) {
    %c0_i32 = arith.constant 0 : i32
    %c0_i32_0 = arith.constant 0 : i32
    %c0_i32_1 = arith.constant 0 : i32
    return %arg0, %c0_i32, %c0_i32_0 : i32, i32, i32
  }
  func.func @transform_1(%arg0: i32) -> (i32, i32, i32) {
    %c0_i32 = arith.constant 0 : i32
    %c0_i32_0 = arith.constant 0 : i32
    %c0_i32_1 = arith.constant 0 : i32
    return %arg0, %c0_i32, %c0_i32_0 : i32, i32, i32
  }
  func.func @transform_2(%arg0: i32) -> (i32, i32) {
    %c0_i32 = arith.constant 0 : i32
    %c0_i32_0 = arith.constant 0 : i32
    %c0_i32_1 = arith.constant 0 : i32
    return %c0_i32, %c0_i32_0 : i32, i32
  }
  func.func @transform_3(%arg0: i32) -> (i32, i32, i32) {
    %c0_i32 = arith.constant 0 : i32
    %c0_i32_0 = arith.constant 0 : i32
    %c0_i32_1 = arith.constant 0 : i32
    return %arg0, %c0_i32, %c0_i32_0 : i32, i32, i32
  }
}

</mosaic_0001>

<bundles_post_ra>
// kernel: tpu_custom_call.1
= control target key start
LH: loop header
LB: loop body
LE: loop exit
PB: predicated region body
PF: predicated region fallthrough
CT: control target
= control target key end

     0   :  { %s4968_s0 = inlined_call_operand.hbm [shape: f32[16,16,32], index: 0, kind: input, shape index: {}]   ;;  %s4969_s1 = inlined_call_operand.hbm [shape: f32[16,1,16], index: 1, kind: input, shape index: {}]   ;;  %s4970_s2 = inlined_call_operand.hbm [shape: f32[16,16], index: 2, kind: input, shape index: {}]   ;;  %s4971_s3 = inlined_call_operand.hbm [shape: f32[16,1,16], index: 3, kind: output, shape index: {}]  }
   0x1   :  { %4973 = sst [smem:[#allocation14_spill]] %s4970_s2 }
   0x2   :  { %8 = vsyncpa [#allocation3], 0 }
   0x3   :  { %10 = vsyncpa [#allocation3 + $0x1], 0 }
   0x4   :  { %11 = vsyncpa [#allocation6], 0 }
   0x5   :  { %13 = vsyncpa [#allocation6 + $0x1], 0 }
   0x6   :  { %14 = vsyncpa [#allocation4], 0 }
   0x7   :  { %16 = vsyncpa [#allocation4 + $0x1], 0  ;;  %s3779_s12 = smov 0   ;;  %s3781_s13 = smov 0  }
   0x8   :  { %s3783_s14 = smov 0   ;;  %s3785_s15 = smov 0  }
   0x9 LB: > { %s3800_s16 = sadd.s32 4294967295, %s3750_s15   ;;  %s3025_s17 = sadd.s32 4294967294, %s3750_s15   ;;  %s3750_s15 = sphi %s3785_s15, %s5009_s15   ;;  %s3746_s14 = sphi %s3783_s14, %s5008_s14   ;;  %s3742_s13 = sphi %s3781_s13, %s5007_s13   ;;  %s3738_s12 = sphi %s3779_s12, %s5006_s12  }
   0xa   : > { %p42_p0 = scmp.ne.s32.totalorder %s3742_s13, %s3738_s12  ;;  %p43_p1 = scmp.eq.s32.totalorder %s3800_s16, 0 }
   0xb   : > { %p113_p2 = scmp.eq.s32.totalorder %s3800_s16, 1  ;;  %p119_p3 = scmp.eq.s32.totalorder %s3025_s17, 1 }
   0xc   : > { %p3809_p4 = por %p43_p1, %p42_p0  ;;  %p3026_p5 = scmp.ge.s32.totalorder %s3750_s15, 1 }
   0xd   : > { %p3814_p6 = por %p119_p3, %p42_p0  ;;  %p126_p7 = scmp.lt.s32.totalorder %s3750_s15, 3 }
   0xe   : > { %s4976_s2 = sld [smem:[#allocation14_spill]]  ;;  %s3752_s24 = smov [#allocation7]  }
   0xf   : > { %p3822_p8 = pnand %p3026_p5, %p126_p7  ;;  %s139_s25 = sshll.u32 %s3752_s24, 4  ;;  %s140_s25 = int_to_ptr.vmem [resolvable:$true] %s139_s25 }
  0x10   : > { %s3832_s26 = sadd.s32 1, %s3750_s15   ;;  %s4972_s27 = smov 128  }
  0x11   : > { %p3328_p9 = pneg %p3822_p8  ;;  %s3754_s28 = smov 8  }
  0x12   : > { %s26_s29 = ssub.s32 %s3750_s15, %s3832_s26  ;;  %s29_s30 = sadd.s32 1, %s3746_s14 }
  0x13   : > { %p3329_p10 = pnand %p3328_p9, %p43_p1  ;;  %p27_p12 = scmp.eq.s32.totalorder %s26_s29, 0 }
  0x14   : > { %s137_s22 = sshll.u32 %s4976_s2, 4  ;;  %p36_p13 = scmp.ne.s32.totalorder %s3746_s14, %s3742_s13  ;;  %s138_s22 = int_to_ptr.hbm [resolvable:$true] %s137_s22 }
  0x15   : > { %3331 = dma.hbm_to_vmem [thread:$0]  (!%p3329_p10), %s138_s22, 256, %s140_s25, [#allocation6], %s4972_s27, %s4972_s27, %s3754_s28  }
  0x16   : > { %p37_p0 = scmp.eq.s32.totalorder %s3750_s15, 0  ;;  %p3344_p3 = scmp.lt.s32.totalorder %s3750_s15, 2 }
  0x17   : > { %s3845_s4 = scalar_select %p27_p12, %s3746_s14, %s29_s30  }
  0x18   : > { %p38_p5 = por %p37_p0, %p36_p13  ;;  %p3849_p7 = por %p113_p2, %p36_p13 }
  0x19   : > { %4978 = sst [smem:[#allocation13_spill]] %s3845_s4  ;;  %s3854_s6 = sand.u32 1, %s3746_s14  }
  0x1a   : > { %s3317_s7 = sshll.u32 %s3750_s15, 7  ;;  %s3029_s8 = sshll.u32 %s3854_s6, 7 }
  0x1b   : > { %s163_s11 = scalar_lea.hbm %s4968_s0, %s3317_s7  ;;  %s157_s20 = scalar_lea.vmem [#allocation2], %s3029_s8 }
  0x1c   : > { %s164_s17 = sshll.u32 %s163_s11, 4  ;;  %s166_s21 = sshll.u32 %s157_s20, 4  ;;  %s165_s17 = int_to_ptr.hbm [resolvable:$true] %s164_s17  ;;  %s167_s21 = int_to_ptr.vmem [resolvable:$true] %s166_s21 }
  0x1d   : > { %p3863_p2 = pnand %p3344_p3, %p38_p5  ;;  %s176_s24 = sand.u32 1, %s3750_s15  }
  0x1e   : > { %s3033_s25 = sshll.u32 %s3854_s6, 3  ;;  %s154_s29 = scalar_lea.sflag [#allocation3], %s3854_s6 }
  0x1f   : > { %s3616_s30 = sshra.s32 %s165_s17, 4  ;;  %p3620_p10 = pneg %p3863_p2  ;;  %s3617_s30 = int_to_ptr.hbm [resolvable:$true] %s3616_s30 }
  0x20   : > { %s3618_s27 = scalar_lea.hbm %s3617_s30, 128  ;;  %s3623_s9 = scalar_lea.hbm %s4968_s0, 256 }
  0x21   : > { %p3619_p9 = scmp.ne.s32.totalorder %s3617_s30, %s3618_s27  ;;  %p3624_p0 = scmp.lt.s32.totalorder %s3617_s30, %s4968_s0 }
  0x22   : > { %p3625_p3 = scmp.lt.s32.totalorder %s3623_s9, %s3618_s27 }
  0x23   : > { %p3621_p12 = pnand %p3620_p10, %p3619_p9 }
  0x24   : > { %p3626_p5 = por %p3625_p3, %p3624_p0 }
  0x25   : > { %p3622_p13 = pneg %p3621_p12 }
  0x27   : > { %p3627_p11 = pnand %p3626_p5, %p3622_p13 }
  0x29   : > { %3630 = shalt.err (!%p3627_p11)
}
  0x2a   : > { %s4981_s6 = smov 128   ;;  %s3034_s20 = sshll.u32 %s3750_s15, 3 }
  0x2b   : > { %3335 = dma.hbm_to_vmem [thread:$0]  (!%p3863_p2), %s165_s17, 2048, %s167_s21, %s154_s29, %s4981_s6, %s4981_s6, %s3754_s28  }
  0x2c   : > { %s180_s2 = scalar_lea.vmem [#allocation5], %s3033_s25  ;;  %s184_s10 = scalar_lea.hbm %s4969_s1, %s3034_s20 }
  0x2d   : > { %s187_s7 = sshll.u32 %s180_s2, 4  ;;  %s185_s27 = sshll.u32 %s184_s10, 4  ;;  %s188_s7 = int_to_ptr.vmem [resolvable:$true] %s187_s7  ;;  %s186_s27 = int_to_ptr.hbm [resolvable:$true] %s185_s27 }
  0x2e   : > { %s177_s30 = scalar_lea.sflag [#allocation6], %s176_s24  ;;  %s3646_s9 = sshra.s32 %s186_s27, 4  ;;  %s3647_s9 = int_to_ptr.hbm [resolvable:$true] %s3646_s9 }
  0x2f   : > { %s3648_s11 = scalar_lea.hbm %s3647_s9, 8  ;;  %s3653_s2 = scalar_lea.hbm %s4969_s1, 16 }
  0x30   : > { %p3649_p11 = scmp.ne.s32.totalorder %s3647_s9, %s3648_s11  ;;  %p3654_p13 = scmp.lt.s32.totalorder %s3647_s9, %s4969_s1 }
  0x31   : > { %p3655_p0 = scmp.lt.s32.totalorder %s3653_s2, %s3648_s11 }
  0x32   : > { %p3651_p9 = pnand %p3649_p11, %p3620_p10 }
  0x33   : > { %p3656_p3 = por %p3655_p0, %p3654_p13 }
  0x34   : > { %p3652_p12 = pneg %p3651_p9 }
  0x36   : > { %p3657_p5 = pnand %p3656_p3, %p3652_p12 }
  0x38   : > { %3660 = shalt.err (!%p3657_p5)
}
  0x39   : > { %s3755_s4 = smov 16   ;;  %s3756_s24 = smov 1  }
  0x3a   : > { %3338 = dma.hbm_to_vmem [thread:$0]  (!%p3863_p2), %s186_s27, 128, %s188_s7, %s177_s30, %s3755_s4, %s3755_s4, %s3756_s24  }
  0x3b   : > { %199 = sbr.rel (%p3822_p8) target bundleno = 1816 (0x718), region = 32  ;;  %s3904_s29 = sand.u32 (!%p3822_p8), 1, %s3742_s13  }
  0x3c   : > { %s3036_s6 = sshll.u32 (!%p3822_p8), %s3904_s29, 7  ;;  %s202_s20 = scalar_lea.sflag (!%p3822_p8), [#allocation3], %s3904_s29 }
  0x3d   : > { %s3908_s8 = scalar_lea.vmem (!%p3822_p8), [#allocation2], %s3036_s6 }
  0x40   : > { %3721 = dma.done.wait (%p3809_p4), %s202_s20, 2048  }
  0x41   : > { %3723 = vsyncadd (%p3809_p4), %s202_s20, 4294965248  ;;  %s211_s23 = sand.u32 1, %s3800_s16   ;;  %s3037_s22 = sshll.u32 %s3904_s29, 3 }
  0x42   : > { %s212_s7 = scalar_lea.sflag [#allocation6], %s211_s23  ;;  %s3918_s10 = scalar_lea.vmem [#allocation5], %s3037_s22 }
  0x43   : > { %3725 = dma.done.wait (%p3809_p4), %s212_s7, 128  }
  0x44   : > { %3727 = vsyncadd (%p3809_p4), %s212_s7, 4294967168 }
  0x45   : > { %3729 = dma.done.wait (%p43_p1), [#allocation6], 256  }
  0x46   : > { %3731 = vsyncadd (%p43_p1), [#allocation6], 4294967040  ;;  %v3929_v0 = vld [vmem:[%s3908_s8 + $0x68] sm:$0xff]  ;;  %vm294_vm0 = vcmask 261120   ;;  %v3935_v2 = vld [vmem:[%s3908_s8 + $0x20] sm:$0xff]  ;;  %s248_s18 = scalar_lea.vmem [#allocation8], %s3037_s22 }
  0x47   : > { %v3932_v1 = vld [vmem:[%s3908_s8 + $0x28] sm:$0xff]  ;;  %v291_v3 = vmul.f32 %v3929_v0, %v3929_v0  ;;  %v282_v5 = vmul.f32 %v3935_v2, %v3935_v2  ;;  %v3944_v6 = vld [vmem:[%s3908_s8 + $0x78] sm:$0xff]  ;;  %v3953_v11 = vld [vmem:[%s3908_s8 + $0x30] sm:$0xff]  ;;  %s3313_s27 = sshll.u32 %s3800_s16, 3  ;;  %s2917_s28 = sshll.u32 %s248_s18, 4  ;;  %s2918_s28 = int_to_ptr.vmem [resolvable:$true] %s2917_s28 }
  0x48   : > { %v283_v4 = vmul.f32 %v3932_v1, %v3932_v1  ;;  %v3947_v7 = vld [vmem:[%s3908_s8 + $0x38] sm:$0xff]  ;;  %v293_v12 = vmul.f32 %v3944_v6, %v3944_v6  ;;  %v284_v14 = vmul.f32 %v3953_v11, %v3953_v11  ;;  %v3965_v18 = vld [vmem:[%s3908_s8 + $0x60] sm:$0xff]  ;;  %v3968_v19 = vld [vmem:[%s3908_s8 + $0x8] sm:$0xff]  ;;  %s2916_s11 = scalar_lea.hbm %s4971_s3, %s3313_s27  ;;  %s2906_s16 = scalar_lea.sflag [#allocation4], %s3904_s29 }
  0x49   : > { %v334_v8 = vsel %vm294_vm0, %v291_v3, 0.0  ;;  %v307_v10 = vsel %vm294_vm0, %v282_v5, 0.0  ;;  %v285_v13 = vmul.f32 %v3947_v7, %v3947_v7  ;;  %v3971_v20 = vld [vmem:[%s3908_s8 + $0x70] sm:$0xff]  ;;  %v290_v21 = vmul.f32 %v3965_v18, %v3965_v18  ;;  %v3983_v27 = vld [vmem:[%s3908_s8 + $0x18] sm:$0xff]  ;;  %v3989_v29 = vld [vmem:[%s3908_s8] sm:$0xff]  ;;  %s2919_s17 = sshll.u32 %s2916_s11, 4  ;;  %s2920_s17 = int_to_ptr.hbm [resolvable:$true] %s2919_s17 }
  0x4a   : > { %v310_v9 = vsel %vm294_vm0, %v283_v4, 0.0  ;;  %335 = vadd.xlane.f32.xlu2 %v334_v8  ;;  %308 = vadd.xlane.f32.xlu1 %v307_v10  ;;  %v340_v15 = vsel %vm294_vm0, %v293_v12, 0.0  ;;  %v313_v17 = vsel %vm294_vm0, %v284_v14, 0.0  ;;  %v279_v22 = vmul.f32 %v3968_v19, %v3968_v19  ;;  %v3986_v28 = vld [vmem:[%s3908_s8 + $0x10] sm:$0xff]  ;;  %v4001_v36 = vld [vmem:[%s3908_s8 + $0x48] sm:$0xff]  ;;  %v4004_v37 = vld [vmem:[%s3908_s8 + $0x40] sm:$0xff] }
  0x4b   : > { %311 = vadd.xlane.f32.xlu0 %v310_v9  ;;  %v316_v16 = vsel %vm294_vm0, %v285_v13, 0.0  ;;  %v292_v23 = vmul.f32 %v3971_v20, %v3971_v20  ;;  %v331_v24 = vsel %vm294_vm0, %v290_v21, 0.0  ;;  %v281_v30 = vmul.f32 %v3983_v27, %v3983_v27  ;;  %v4007_v38 = vld [vmem:[%s3908_s8 + $0x58] sm:$0xff]  ;;  %v4019_v45 = vld [vmem:[%s3908_s8 + $0x50] sm:$0xff]  ;;  %s3690_s2 = sshra.s32 %s2920_s17, 4  ;;  %s3696_s24 = scalar_lea.hbm %s4971_s3, 16  ;;  %s3691_s2 = int_to_ptr.hbm [resolvable:$true] %s3690_s2 }
  0x4c   : > { %v298_v25 = vsel %vm294_vm0, %v279_v22, 0.0  ;;  %v280_v31 = vmul.f32 %v3986_v28, %v3986_v28  ;;  %v278_v32 = vmul.f32 %v3989_v29, %v3989_v29  ;;  %v287_v39 = vmul.f32 %v4001_v36, %v4001_v36  ;;  %s3692_s21 = scalar_lea.hbm %s3691_s2, 8  ;;  %p3697_p2 = scmp.lt.s32.totalorder %s3691_s2, %s4971_s3 }
  0x4d   : > { %v337_v26 = vsel %vm294_vm0, %v292_v23, 0.0  ;;  %v304_v33 = vsel %vm294_vm0, %v281_v30, 0.0  ;;  %v286_v40 = vmul.f32 %v4004_v37, %v4004_v37  ;;  %v289_v41 = vmul.f32 %v4007_v38, %v4007_v38  ;;  %p3693_p1 = scmp.ne.s32.totalorder %s3691_s2, %s3692_s21  ;;  %p3698_p10 = scmp.lt.s32.totalorder %s3696_s24, %s3692_s21 }
  0x4e   : > { %v301_v34 = vsel %vm294_vm0, %v280_v31, 0.0  ;;  %v295_v35 = vsel %vm294_vm0, %v278_v32, 0.0  ;;  %v322_v42 = vsel %vm294_vm0, %v287_v39, 0.0  ;;  %v288_v46 = vmul.f32 %v4019_v45, %v4019_v45 }
  0x4f   : > { %v319_v43 = vsel %vm294_vm0, %v286_v40, 0.0  ;;  %v328_v44 = vsel %vm294_vm0, %v289_v41, 0.0  ;;  %p3694_p4 = pnand %p3693_p1, %p3849_p7  ;;  %p3699_p11 = por %p3698_p10, %p3697_p2 }
  0x50   : > { %v325_v47 = vsel %vm294_vm0, %v288_v46, 0.0 }
  0x51   : > { %p3695_p8 = pneg %p3694_p4 }
  0x52   : > { %341 = vadd.xlane.f32.xlu2 %v340_v15  ;;  %314 = vadd.xlane.f32.xlu1 %v313_v17 }
  0x53   : > { %317 = vadd.xlane.f32.xlu0 %v316_v16  ;;  %p3700_p9 = pnand %p3699_p11, %p3695_p8 }
  0x5a   : > { %299 = vadd.xlane.f32.xlu2 %v298_v25  ;;  %338 = vadd.xlane.f32.xlu1 %v337_v26 }
  0x5b   : > { %332 = vadd.xlane.f32.xlu0 %v331_v24 }
  0x62   : > { %302 = vadd.xlane.f32.xlu2 %v301_v34  ;;  %296 = vadd.xlane.f32.xlu1 %v295_v35 }
  0x63   : > { %305 = vadd.xlane.f32.xlu0 %v304_v33 }
  0x6a   : > { %320 = vadd.xlane.f32.xlu2 %v319_v43  ;;  %329 = vadd.xlane.f32.xlu1 %v328_v44 }
  0x6b   : > { %323 = vadd.xlane.f32.xlu0 %v322_v42 }
  0x73   : > { %326 = vadd.xlane.f32.xlu0 %v325_v47 }
  0xbd   : > { %v336_v48 = vpop.xlane.xlu2 %335  ;;  %v309_v50 = vpop.xlane.xlu1 %308 }
  0xbe   : > { %v312_v49 = vpop.xlane.xlu0 %311  ;;  %3386 = vrsqrt.f32 %v336_v48  ;;  %vm479_vm1 = vweird.f32 %v336_v48  ;;  %vm389_vm8 = vweird.f32 %v309_v50 }
  0xbf   : > { %3388 = vrsqrt.f32 %v312_v49  ;;  %vm399_vm3 = vweird.f32 %v312_v49 }
  0xc0   : > { %3390 = vrsqrt.f32 %v309_v50 }
  0xc4   : > { %v4024_v51 = vpop.eup %3386 }
  0xc5   : > { %v3389_v52 = vpop.eup %3388  ;;  %v474_v53 = vmul.f32 %v4024_v51, %v336_v48  ;;  %v4027_v54 = vpop.xlane.xlu2 %341  ;;  %vm480_vm2 = vweird.f32 %v4024_v51 }
  0xc6   : > { %v4029_v55 = vpop.xlane.xlu0 %317  ;;  %v4031_v56 = vpop.eup %3390  ;;  %v394_v57 = vmul.f32 %v3389_v52, %v312_v49  ;;  %3392 = vrsqrt.f32 %v4027_v54  ;;  %vm400_vm4 = vweird.f32 %v3389_v52  ;;  %vm4068_vm6 = vmor %vm479_vm1, %vm480_vm2  ;;  %vm499_vm9 = vweird.f32 %v4027_v54 }
  0xc7   : > { %v4034_v58 = vpop.xlane.xlu1 %314  ;;  %v475_v59 = vmul.f32 %v4024_v51, %v474_v53  ;;  %v384_v60 = vmul.f32 %v4031_v56, %v309_v50  ;;  %3394 = vrsqrt.f32 %v4029_v55  ;;  %vm390_vm5 = vweird.f32 %v4031_v56  ;;  %vm401_vm7 = vmor %vm399_vm3, %vm400_vm4 }
  0xc8   : > { %v395_v61 = vmul.f32 %v3389_v52, %v394_v57  ;;  %3396 = vrsqrt.f32 %v4034_v58  ;;  %vm419_vm10 = vweird.f32 %v4029_v55  ;;  %vm4081_vm11 = vmor %vm389_vm8, %vm390_vm5  ;;  %vm409_vm14 = vweird.f32 %v4034_v58 }
  0xc9   : > { %v476_v62 = vmul.f32 0.5, %v475_v59  ;;  %v385_v63 = vmul.f32 %v4031_v56, %v384_v60 }
  0xca   : > { %v396_v3 = vmul.f32 0.5, %v395_v61 }
  0xcb   : > { %v386_v4 = vmul.f32 0.5, %v385_v63  ;;  %v477_v8 = vsub.f32 1.5, %v476_v62 }
  0xcc   : > { %v4041_v5 = vpop.eup %3392  ;;  %v397_v10 = vsub.f32 1.5, %v396_v3 }
  0xcd   : > { %v4043_v9 = vpop.eup %3394  ;;  %v387_v12 = vsub.f32 1.5, %v386_v4  ;;  %v494_v13 = vmul.f32 %v4041_v5, %v4027_v54  ;;  %v4049_v15 = vpop.xlane.xlu2 %299  ;;  %v478_v24 = vmul.f32 %v4024_v51, %v477_v8  ;;  %vm500_vm12 = vweird.f32 %v4041_v5 }
  0xce   : > { %v4047_v14 = vpop.xlane.xlu0 %332  ;;  %v4051_v16 = vpop.eup %3396  ;;  %v414_v17 = vmul.f32 %v4043_v9, %v4029_v55  ;;  %v398_v33 = vmul.f32 %v3389_v52, %v397_v10  ;;  %vm420_vm13 = vweird.f32 %v4043_v9  ;;  %vm4119_vm1 = vmor %vm499_vm9, %vm500_vm12 }
  0xcf   : > { %3398 = vrsqrt.f32 %v4047_v14  ;;  %v4057_v21 = vpop.xlane.xlu1 %338  ;;  %v495_v22 = vmul.f32 %v4041_v5, %v494_v13  ;;  %v404_v23 = vmul.f32 %v4051_v16, %v4034_v58  ;;  %v388_v25 = vmul.f32 %v4031_v56, %v387_v12  ;;  %vm421_vm2 = vmor %vm419_vm10, %vm420_vm13 }
  0xd0   : > { %v415_v26 = vmul.f32 %v4043_v9, %v414_v17  ;;  %3400 = vrsqrt.f32 %v4057_v21  ;;  %v402_v40 = vsel %vm401_vm7, %v3389_v52, %v398_v33  ;;  %v482_v50 = vsel %vm4068_vm6, %v4024_v51, %v478_v24 }
  0xd1   : > { %v496_v31 = vmul.f32 0.5, %v495_v22  ;;  %v405_v32 = vmul.f32 %v4051_v16, %v404_v23  ;;  %3402 = vrsqrt.f32 %v4049_v15  ;;  %v4088_v44 = vmul.f32 %v402_v40, %v3932_v1 }
  0xd2   : > { %v416_v34 = vmul.f32 0.5, %v415_v26  ;;  %v392_v49 = vsel %vm4081_vm11, %v4031_v56, %v388_v25  ;;  %vm410_vm15 = vweird.f32 %v4051_v16  ;;  %v4136_v3 = vmul.f32 %v482_v50, %v3929_v0 }
  0xd3   : > { %v497_v35 = vsub.f32 1.5, %v496_v31  ;;  %v406_v39 = vmul.f32 0.5, %v405_v32  ;;  %3048 = vmatpush.xpose.msk.msra.mxu2 %vm294_vm0, %v4088_v44  ;;  %v507_v54 = vmul.f32 %v392_v49, %v3935_v2  ;;  %vm4145_vm3 = vmor %vm409_vm14, %vm410_vm15  ;;  %vm469_vm4 = vweird.f32 %v4047_v14 }
  0xd4   : > { %v417_v43 = vsub.f32 1.5, %v416_v34  ;;  %vm489_vm6 = vweird.f32 %v4057_v21  ;;  %vm359_vm7 = vweird.f32 %v4049_v15 }
  0xd5   : > { %v4077_v41 = vpop.eup %3398  ;;  %v407_v46 = vsub.f32 1.5, %v406_v39  ;;  %v4100_v52 = vpop.xlane.xlu2 %302  ;;  %v498_v51 = vmul.f32 %v4041_v5, %v497_v35 }
  0xd6   : > { %v464_v47 = vmul.f32 %v4077_v41, %v4047_v14  ;;  %v4092_v48 = vpop.xlane.xlu0 %305  ;;  %v4102_v53 = vpop.eup %3400  ;;  %v418_v56 = vmul.f32 %v4043_v9, %v417_v43  ;;  %vm470_vm5 = vweird.f32 %v4077_v41 }
  0xd7   : > { %3404 = vrsqrt.f32 %v4092_v48  ;;  %v4109_v1 = vpop.xlane.xlu1 %296  ;;  %v4112_v57 = vpop.eup %3402  ;;  %v408_v60 = vmul.f32 %v4051_v16, %v407_v46  ;;  %v484_v62 = vmul.f32 %v4102_v53, %v4057_v21  ;;  %3049 = vmatpush.xpose.msk.msra.mxu2 %vm294_vm0, %v507_v54  ;;  %vm490_vm8 = vweird.f32 %v4102_v53  ;;  %vm471_vm10 = vmor %vm469_vm4, %vm470_vm5 }
  0xd8   : > { %v465_v61 = vmul.f32 %v4077_v41, %v464_v47  ;;  %v354_v63 = vmul.f32 %v4112_v57, %v4049_v15  ;;  %3406 = vrsqrt.f32 %v4109_v1  ;;  %v422_v10 = vsel %vm421_vm2, %v4043_v9, %v418_v56  ;;  %vm491_vm11 = vmor %vm489_vm6, %vm490_vm8 }
  0xd9   : > { %v485_v8 = vmul.f32 %v4102_v53, %v484_v62  ;;  %3408 = vrsqrt.f32 %v4100_v52  ;;  %v4153_v2 = vmul.f32 %v422_v10, %v3947_v7  ;;  %v412_v58 = vsel %vm4145_vm3, %v4051_v16, %v408_v60 }
  0xda   : > { %v466_v4 = vmul.f32 0.5, %v465_v61  ;;  %v355_v0 = vmul.f32 %v4112_v57, %v354_v63  ;;  %v502_v9 = vsel %vm4119_vm1, %v4041_v5, %v498_v51  ;;  %3050 = vmatmul.msk.f32.vlgmr.msra.gmra.mxu2 %vm294_vm0, %v507_v54  ;;  %vm360_vm9 = vweird.f32 %v4112_v57 }
  0xdb   : > { %v486_v13 = vmul.f32 0.5, %v485_v8  ;;  %3064 = vmatpush.xpose.msk.msrb.mxu2 %vm294_vm0, %v4136_v3  ;;  %3052 = vmatpush.xpose.msk.msra.mxu3 %vm294_vm0, %v4153_v2  ;;  %v509_v26 = vmul.f32 %v412_v58, %v3953_v11  ;;  %v4184_v30 = vmul.f32 %v502_v9, %v3944_v6  ;;  %vm379_vm12 = vweird.f32 %v4092_v48  ;;  %vm4218_vm13 = vmor %vm359_vm7, %vm360_vm9 }
  0xdc   : > { %v467_v12 = vsub.f32 1.5, %v466_v4  ;;  %v356_v7 = vmul.f32 0.5, %v355_v0  ;;  %vm349_vm15 = vweird.f32 %v4109_v1  ;;  %vm369_vm2 = vweird.f32 %v4100_v52 }
  0xdd   : > { %v4163_v17 = vpop.eup %3404  ;;  %v487_v23 = vsub.f32 1.5, %v486_v13  ;;  %v4177_v24 = vpop.xlane.xlu2 %320 }
  0xde   : > { %v468_v22 = vmul.f32 %v4077_v41, %v467_v12  ;;  %v374_v5 = vmul.f32 %v4163_v17, %v4092_v48  ;;  %v4175_v16 = vpop.xlane.xlu0 %323  ;;  %v4179_v25 = vpop.eup %3406  ;;  %v357_v33 = vsub.f32 1.5, %v356_v7  ;;  %vm380_vm14 = vweird.f32 %v4163_v17  ;;  %v4378_v48 = vld [vmem:[%s3918_s10 + $0x6] sm:$0x1] }
  0xdf   : > { %3410 = vrsqrt.f32 %v4175_v16  ;;  %v4187_v31 = vpop.eup %3408  ;;  %v488_v32 = vmul.f32 %v4102_v53, %v487_v23  ;;  %v344_v11 = vmul.f32 %v4179_v25, %v4109_v1  ;;  %v4197_v35 = vpop.xlane.xlu1 %329  ;;  %3053 = vmatpush.xpose.msk.msra.mxu3 %vm294_vm0, %v509_v26  ;;  %vm350_vm1 = vweird.f32 %v4179_v25  ;;  %vm4239_vm4 = vmor %vm379_vm12, %vm380_vm14 }
  0xe0   : > { %v375_v34 = vmul.f32 %v4163_v17, %v374_v5  ;;  %v364_v6 = vmul.f32 %v4187_v31, %v4100_v52  ;;  %v472_v14 = vsel %vm471_vm10, %v4077_v41, %v468_v22  ;;  %3412 = vrsqrt.f32 %v4177_v24  ;;  %vm4255_vm5 = vmor %vm349_vm15, %vm350_vm1 }
  0xe1   : > { %v345_v40 = vmul.f32 %v4179_v25, %v344_v11  ;;  %v515_v21 = vmul.f32 %v472_v14, %v3965_v18  ;;  %v492_v42 = vsel %vm491_vm11, %v4102_v53, %v488_v32  ;;  %3414 = vrsqrt.f32 %v4197_v35 }
  0xe2   : > { %v376_v39 = vmul.f32 0.5, %v375_v34  ;;  %v365_v41 = vmul.f32 %v4187_v31, %v364_v6  ;;  %v4225_v46 = vmul.f32 %v492_v42, %v3971_v20  ;;  %3054 = vmatmul.msk.f32.vlgmr.msra.gmra.mxu3 %vm294_vm0, %v509_v26  ;;  %v358_v15 = vmul.f32 %v4112_v57, %v357_v33  ;;  %3051 = vmatmul.msk.f32.gmra.mxu2 %vm294_vm0, %v4088_v44  ;;  %v4349_v42 = vld [vmem:[#allocation7 + $0x8] sm:$0xff] }
  0xe3   : > { %3068 = vmatpush.xpose.msk.msrb.mxu3 %vm294_vm0, %v4184_v30  ;;  %v346_v18 = vmul.f32 0.5, %v345_v40  ;;  %3065 = vmatpush.xpose.msk.msrb.mxu2 %vm294_vm0, %v515_v21  ;;  %vm370_vm3 = vweird.f32 %v4187_v31  ;;  %vm439_vm7 = vweird.f32 %v4175_v16  ;;  %vm429_vm8 = vweird.f32 %v4177_v24 }
  0xe4   : > { %v377_v49 = vsub.f32 1.5, %v376_v39  ;;  %v366_v50 = vmul.f32 0.5, %v365_v41  ;;  %v362_v51 = vsel %vm4218_vm13, %v4112_v57, %v358_v15  ;;  %vm4265_vm6 = vmor %vm369_vm2, %vm370_vm3  ;;  %vm459_vm12 = vweird.f32 %v4197_v35  ;;  %v4352_v41 = vld [vmem:[%s3918_s10 + $0x3] sm:$0x1] }
  0xe5   : > { %v3411_v47 = vpop.eup %3410  ;;  %v347_v53 = vsub.f32 1.5, %v346_v18  ;;  %v4260_v61 = vmul.f32 %v362_v51, %v3968_v19  ;;  %v4357_v18 = vld [vmem:[#allocation7] sm:$0xff]  ;;  %v770_v15 = vmul.f32 0.5, %v4352_v41 }
  0xe6   : > { %v434_v56 = vmul.f32 %v3411_v47, %v4175_v16  ;;  %v327_v59 = vpop.xlane.xlu0 %326  ;;  %v3413_v60 = vpop.eup %3412  ;;  %v367_v44 = vsub.f32 1.5, %v366_v50  ;;  %v378_v19 = vmul.f32 %v4163_v17, %v377_v49  ;;  %vm440_vm9 = vweird.f32 %v3411_v47 }
  0xe7   : > { %3069 = vmatpush.xpose.msk.msrb.mxu3 %vm294_vm0, %v4225_v46  ;;  %3416 = vrsqrt.f32 %v327_v59  ;;  %v348_v62 = vmul.f32 %v4179_v25, %v347_v53  ;;  %v424_v1 = vmul.f32 %v3413_v60, %v4177_v24  ;;  %v3415_v54 = vpop.eup %3414  ;;  %3040 = vmatpush.xpose.msk.msra.mxu0 %vm294_vm0, %v4260_v61  ;;  %vm430_vm10 = vweird.f32 %v3413_v60  ;;  %vm4291_vm11 = vmor %vm439_vm7, %vm440_vm9 }
  0xe8   : > { %v435_v63 = vmul.f32 %v3411_v47, %v434_v56  ;;  %v368_v4 = vmul.f32 %v4187_v31, %v367_v44  ;;  %v454_v10 = vmul.f32 %v3415_v54, %v4197_v35  ;;  %v382_v0 = vsel %vm4239_vm4, %v4163_v17, %v378_v19  ;;  %vm4302_vm14 = vmor %vm429_vm8, %vm430_vm10  ;;  %v4371_v56 = vld [vmem:[%s3918_s10] sm:$0x1] }
  0xe9   : > { %v425_v8 = vmul.f32 %v3413_v60, %v424_v1  ;;  %v352_v55 = vsel %vm4255_vm5, %v4179_v25, %v348_v62  ;;  %vm460_vm13 = vweird.f32 %v3415_v54  ;;  %v506_v17 = vmul.f32 %v382_v0, %v3983_v27 }
  0xea   : > { %v436_v52 = vmul.f32 0.5, %v435_v63  ;;  %v372_v12 = vsel %vm4265_vm6, %v4187_v31, %v368_v4  ;;  %v455_v9 = vmul.f32 %v3415_v54, %v454_v10  ;;  %3055 = vmatmul.msk.f32.gmra.mxu3 %vm294_vm0, %v4153_v2  ;;  %v503_v7 = vmul.f32 %v352_v55, %v3989_v29  ;;  %3066 = vmatmul.msk.f32.vlgmr.msrb.gmra.mxu2 %vm294_vm0, %v515_v21  ;;  %vm4313_vm15 = vmor %vm459_vm12, %vm460_vm13 }
  0xeb   : > { %v426_v58 = vmul.f32 0.5, %v425_v8  ;;  %3044 = vmatpush.xpose.msk.msra.mxu1 %vm294_vm0, %v506_v17  ;;  %v505_v16 = vmul.f32 %v372_v12, %v3986_v28  ;;  %vm449_vm1 = vweird.f32 %v327_v59  ;;  %vm783_vm4 = vcmask 130048   ;;  %v4400_v8 = vld [vmem:[%s3918_s10 + $0x7] sm:$0x1] }
  0xec   : > { %v437_v13 = vsub.f32 1.5, %v436_v52  ;;  %v456_v26 = vmul.f32 0.5, %v455_v9  ;;  %3041 = vmatpush.xpose.msk.msra.mxu0 %vm294_vm0, %v503_v7  ;;  %v773_v63 = vmul.f32 0.5, %v4378_v48  ;;  %v774_v12 = vmul.f32 0.5, %v4400_v8 }
  0xed   : > { %v3417_v22 = vpop.eup %3416  ;;  %v427_v25 = vsub.f32 1.5, %v426_v58 }
  0xee   : > { %v438_v5 = vmul.f32 %v3411_v47, %v437_v13  ;;  %v444_v2 = vmul.f32 %v3417_v22, %v327_v59  ;;  %v457_v31 = vsub.f32 1.5, %v456_v26  ;;  %vm450_vm2 = vweird.f32 %v3417_v22 }
  0xef   : > { %v428_v27 = vmul.f32 %v3413_v60, %v427_v25  ;;  %3042 = vmatmul.msk.f32.vlgmr.msra.gmra.mxu0 %vm294_vm0, %v503_v7  ;;  %3045 = vmatpush.xpose.msk.msra.mxu1 %vm294_vm0, %v505_v16  ;;  %vm451_vm3 = vmor %vm449_vm1, %vm450_vm2 }
  0xf0   : > { %v445_v32 = vmul.f32 %v3417_v22, %v444_v2  ;;  %v442_v33 = vsel %vm4291_vm11, %v3411_v47, %v438_v5  ;;  %v458_v11 = vmul.f32 %v3415_v54, %v457_v31  ;;  %v4428_v5 = vld [vmem:[%s3918_s10 + $0x4] sm:$0x1] }
  0xf1   : > { %v512_v24 = vmul.f32 %v442_v33, %v4001_v36  ;;  %v432_v6 = vsel %vm4302_vm14, %v3413_v60, %v428_v27  ;;  %v767_v60 = vmul.f32 0.5, %v4371_v56  ;;  %v771_v2 = vmul.f32 0.5, %v4428_v5 }
  0xf2   : > { %v446_v28 = vmul.f32 0.5, %v445_v32  ;;  %v511_v35 = vmul.f32 %v432_v6, %v4004_v37  ;;  %3070 = vmatmul.msk.f32.vlgmr.msrb.gmra.mxu3 %vm294_vm0, %v4225_v46  ;;  %v462_v39 = vsel %vm4313_vm15, %v3415_v54, %v458_v11  ;;  %3046 = vmatmul.msk.f32.vlgmr.msra.gmra.mxu1 %vm294_vm0, %v505_v16  ;;  %v4445_v16 = vld [vmem:[%s3918_s10 + $0x5] sm:$0x1] }
  0xf3   : > { %3056 = vmatpush.xpose.msk.msrb.mxu0 %vm294_vm0, %v512_v24  ;;  %v514_v36 = vmul.f32 %v462_v39, %v4007_v38  ;;  %3067 = vmatmul.msk.f32.gmra.mxu2 %vm294_vm0, %v4136_v3  ;;  %v4346_v3 = vld [vmem:[%s3918_s10 + $0x2] sm:$0x1]  ;;  %v772_v33 = vmul.f32 0.5, %v4445_v16 }
  0xf4   : > { %v447_v14 = vsub.f32 1.5, %v446_v28 }
  0xf5   : > { %3060 = vmatpush.xpose.msk.msrb.mxu1 %vm294_vm0, %v514_v36 }
  0xf6   : > { %v448_v40 = vmul.f32 %v3417_v22, %v447_v14 }
  0xf7   : > { %3057 = vmatpush.xpose.msk.msrb.mxu0 %vm294_vm0, %v511_v35 }
  0xf8   : > { %v452_v37 = vsel %vm451_vm3, %v3417_v22, %v448_v40  ;;  %3043 = vmatmul.msk.f32.gmra.mxu0 %vm294_vm0, %v4260_v61  ;;  %v4384_v61 = vld [vmem:[%s3918_s10 + $0x1] sm:$0x1] }
  0xf9   : > { %v513_v21 = vmul.f32 %v452_v37, %v4019_v45  ;;  %v769_v45 = vmul.f32 0.5, %v4346_v3  ;;  %v768_v4 = vmul.f32 0.5, %v4384_v61 }
  0xfa   : > { %3071 = vmatmul.msk.f32.gmra.mxu3 %vm294_vm0, %v4184_v30  ;;  %3047 = vmatmul.msk.f32.gmra.mxu1 %vm294_vm0, %v506_v17 }
  0xfb   : > { %3061 = vmatpush.xpose.msk.msrb.mxu1 %vm294_vm0, %v513_v21  ;;  %3418 = vtanh.f32 %v769_v45 }
  0xfc   : > { %3420 = vtanh.f32 %v770_v15 }
  0xfd   : > { %3422 = vtanh.f32 %v767_v60 }
  0xfe   : > { %3424 = vtanh.f32 %v773_v63 }
  0xff   : > { %3426 = vtanh.f32 %v768_v4 }
 0x100   : > { %3058 = vmatmul.msk.f32.vlgmr.msrb.gmra.mxu0 %vm294_vm0, %v511_v35  ;;  %3428 = vtanh.f32 %v774_v12 }
 0x101   : > { %v3419_v20 = vpop.eup %3418  ;;  %3430 = vtanh.f32 %v771_v2 }
 0x102   : > { %3062 = vmatmul.msk.f32.vlgmr.msrb.gmra.mxu1 %vm294_vm0, %v513_v21  ;;  %v3421_v62 = vpop.eup %3420  ;;  %3432 = vtanh.f32 %v772_v33 }
 0x103   : > { %v3423_v13 = vpop.eup %3422 }
 0x104   : > { %v3425_v23 = vpop.eup %3424 }
 0x105   : > { %v3427_v25 = vpop.eup %3426 }
 0x106   : > { %v3429_v27 = vpop.eup %3428 }
 0x107   : > { %v3431_v28 = vpop.eup %3430 }
 0x108   : > { %3059 = vmatmul.msk.f32.gmra.mxu0 %vm294_vm0, %v512_v24  ;;  %v3433_v35 = vpop.eup %3432 }
 0x10a   : > { %3063 = vmatmul.msk.f32.gmra.mxu1 %vm294_vm0, %v514_v36  ;;  %vm2896_vm0 = vcmask 122880  }
 0x15d   : > { %v600_v38 = vpop.f32.mrf.mxu2 }
 0x15e   : > { %v4363_v47 = vmul.f32 %v600_v38, %v4357_v18 }
 0x165   : > { %v629_v43 = vpop.f32.mrf.mxu3  ;;  %v603_v30 = vpop.f32.mrf.mxu2 }
 0x166   : > { %v4355_v46 = vmul.f32 %v603_v30, %v4349_v42  ;;  %v4381_v44 = vmul.f32 %v629_v43, %v4357_v18 }
 0x168   : > { %3078 = vmatpush.xpose.msk.msra.mxu2 %vm783_vm4, %v4355_v46 }
 0x16c   : > { %v542_v49 = vpop.f32.mrf.mxu0  ;;  %3079 = vmatpush.xpose.msk.msra.mxu2 %vm783_vm4, %v4363_v47 }
 0x16d   : > { %v632_v50 = vpop.f32.mrf.mxu3  ;;  %v716_v51 = vpop.f32.mrf.mxu2  ;;  %v4394_v19 = vmul.f32 %v542_v49, %v4357_v18 }
 0x16e   : > { %v4368_v53 = vmul.f32 %v632_v50, %v4349_v42  ;;  %v4414_v58 = vmul.f32 %v716_v51, %v4357_v18 }
 0x16f   : > { %v571_v59 = vpop.f32.mrf.mxu1  ;;  %3080 = vmatmul.msk.f32.vlgmr.msra.gmra.mxu2 %vm783_vm4, %v3419_v20 }
 0x170   : > { %3081 = vmatpush.xpose.msk.msra.mxu3 %vm783_vm4, %v4368_v53  ;;  %v4417_v9 = vmul.f32 %v571_v59, %v4357_v18 }
 0x174   : > { %3082 = vmatpush.xpose.msk.msra.mxu3 %vm783_vm4, %v4381_v44 }
 0x175   : > { %v545_v57 = vpop.f32.mrf.mxu0  ;;  %v745_v54 = vpop.f32.mrf.mxu3 }
 0x176   : > { %v4390_v1 = vmul.f32 %v545_v57, %v4349_v42  ;;  %v719_v52 = vpop.f32.mrf.mxu2  ;;  %v4439_v29 = vmul.f32 %v745_v54, %v4357_v18 }
 0x177   : > { %3083 = vmatmul.msk.f32.vlgmr.msra.gmra.mxu3 %vm783_vm4, %v3421_v62  ;;  %v4403_v10 = vmul.f32 %v719_v52, %v4349_v42  ;;  %v574_v55 = vpop.f32.mrf.mxu1 }
 0x178   : > { %3072 = vmatpush.xpose.msk.msra.mxu0 %vm783_vm4, %v4390_v1  ;;  %v4406_v0 = vmul.f32 %v574_v55, %v4349_v42 }
 0x179   : > { %3090 = vmatpush.xpose.msk.msrb.mxu2 %vm783_vm4, %v4403_v10 }
 0x17a   : > { %3075 = vmatpush.xpose.msk.msra.mxu1 %vm783_vm4, %v4406_v0 }
 0x17c   : > { %3073 = vmatpush.xpose.msk.msra.mxu0 %vm783_vm4, %v4394_v19 }
 0x17d   : > { %v658_v7 = vpop.f32.mrf.mxu0  ;;  %v748_v22 = vpop.f32.mrf.mxu3  ;;  %3091 = vmatpush.xpose.msk.msrb.mxu2 %vm783_vm4, %v4414_v58 }
 0x17e   : > { %v4424_v17 = vmul.f32 %v748_v22, %v4349_v42  ;;  %3076 = vmatpush.xpose.msk.msra.mxu1 %vm783_vm4, %v4417_v9  ;;  %v4458_v34 = vmul.f32 %v658_v7, %v4357_v18 }
 0x17f   : > { %3074 = vmatmul.msk.f32.vlgmr.msra.gmra.mxu0 %vm783_vm4, %v3423_v13  ;;  %v687_v26 = vpop.f32.mrf.mxu1 }
 0x180   : > { %3093 = vmatpush.xpose.msk.msrb.mxu3 %vm783_vm4, %v4424_v17  ;;  %3092 = vmatmul.msk.f32.vlgmr.msrb.gmra.mxu2 %vm783_vm4, %v3425_v23  ;;  %v4475_v6 = vmul.f32 %v687_v26, %v4357_v18 }
 0x181   : > { %3102 = vmatpush.xpose.msk.msra.mxu2 %vm783_vm4, %v4355_v46  ;;  %3077 = vmatmul.msk.f32.vlgmr.msra.gmra.mxu1 %vm783_vm4, %v3427_v25 }
 0x184   : > { %3094 = vmatpush.xpose.msk.msrb.mxu3 %vm783_vm4, %v4439_v29 }
 0x185   : > { %3103 = vmatpush.xpose.msk.msra.mxu2 %vm783_vm4, %v4363_v47  ;;  %v661_v31 = vpop.f32.mrf.mxu0 }
 0x186   : > { %v4452_v32 = vmul.f32 %v661_v31, %v4349_v42 }
 0x187   : > { %3095 = vmatmul.msk.f32.vlgmr.msrb.gmra.mxu3 %vm783_vm4, %v3429_v27  ;;  %v690_v24 = vpop.f32.mrf.mxu1 }
 0x188   : > { %3105 = vmatpush.xpose.msk.msra.mxu3 %vm783_vm4, %v4368_v53  ;;  %3084 = vmatpush.xpose.msk.msrb.mxu0 %vm783_vm4, %v4452_v32  ;;  %v4468_v11 = vmul.f32 %v690_v24, %v4349_v42 }
 0x189   : > { %3114 = vmatpush.xpose.msk.msrb.mxu2 %vm783_vm4, %v4403_v10 }
 0x18a   : > { %3087 = vmatpush.xpose.msk.msrb.mxu1 %vm783_vm4, %v4468_v11 }
 0x18c   : > { %3106 = vmatpush.xpose.msk.msra.mxu3 %vm783_vm4, %v4381_v44  ;;  %3085 = vmatpush.xpose.msk.msrb.mxu0 %vm783_vm4, %v4458_v34 }
 0x18d   : > { %3115 = vmatpush.xpose.msk.msrb.mxu2 %vm783_vm4, %v4414_v58 }
 0x18e   : > { %3088 = vmatpush.xpose.msk.msrb.mxu1 %vm783_vm4, %v4475_v6 }
 0x18f   : > { %3086 = vmatmul.msk.f32.vlgmr.msrb.gmra.mxu0 %vm783_vm4, %v3431_v28 }
 0x190   : > { %3117 = vmatpush.xpose.msk.msrb.mxu3 %vm783_vm4, %v4424_v17  ;;  %3096 = vmatpush.xpose.msk.msra.mxu0 %vm783_vm4, %v4390_v1 }
 0x191   : > { %3089 = vmatmul.msk.f32.vlgmr.msrb.gmra.mxu1 %vm783_vm4, %v3433_v35 }
 0x192   : > { %3099 = vmatpush.xpose.msk.msra.mxu1 %vm783_vm4, %v4406_v0 }
 0x194   : > { %3118 = vmatpush.xpose.msk.msrb.mxu3 %vm783_vm4, %v4439_v29  ;;  %3097 = vmatpush.xpose.msk.msra.mxu0 %vm783_vm4, %v4394_v19 }
 0x196   : > { %3100 = vmatpush.xpose.msk.msra.mxu1 %vm783_vm4, %v4417_v9 }
 0x198   : > { %3108 = vmatpush.xpose.msk.msrb.mxu0 %vm783_vm4, %v4452_v32 }
 0x19a   : > { %3111 = vmatpush.xpose.msk.msrb.mxu1 %vm783_vm4, %v4468_v11 }
 0x19c   : > { %3109 = vmatpush.xpose.msk.msrb.mxu0 %vm783_vm4, %v4458_v34 }
 0x19e   : > { %3112 = vmatpush.xpose.msk.msrb.mxu1 %vm783_vm4, %v4475_v6 }
 0x1f2   : > { %v868_v14 = vpop.f32.mrf.mxu2 }
 0x1f3   : > { %v1018_v39 = vadd.f32 %v868_v14, %v4346_v3 }
 0x1f5   : > { %v1026_v36 = vmul.f32 0.5, %v1018_v39 }
 0x1f7   : > { %3434 = vtanh.f32 %v1026_v36 }
 0x1fa   : > { %v897_v40 = vpop.f32.mrf.mxu3 }
 0x1fb   : > { %v1019_v21 = vadd.f32 %v897_v40, %v4352_v41 }
 0x1fc   : > { %v810_v37 = vpop.f32.mrf.mxu0 }
 0x1fd   : > { %v1016_v38 = vadd.f32 %v810_v37, %v4371_v56  ;;  %v1027_v45 = vmul.f32 0.5, %v1019_v21  ;;  %v3435_v43 = vpop.eup %3434 }
 0x1fe   : > { %v839_v30 = vpop.f32.mrf.mxu1  ;;  %3104 = vmatmul.msk.f32.vlgmr.msra.gmra.mxu2 %vm783_vm4, %v3435_v43 }
 0x1ff   : > { %v1024_v42 = vmul.f32 0.5, %v1016_v38  ;;  %3436 = vtanh.f32 %v1027_v45  ;;  %v1017_v18 = vadd.f32 %v839_v30, %v4384_v61  ;;  %3126 = vmatpush.xpose.msk.msra.mxu2 %vm783_vm4, %v4355_v46 }
 0x201   : > { %3438 = vtanh.f32 %v1024_v42  ;;  %v1025_v15 = vmul.f32 0.5, %v1017_v18 }
 0x203   : > { %v984_v49 = vpop.f32.mrf.mxu2  ;;  %3440 = vtanh.f32 %v1025_v15  ;;  %3127 = vmatpush.xpose.msk.msra.mxu2 %vm783_vm4, %v4363_v47 }
 0x204   : > { %v1022_v20 = vadd.f32 %v984_v49, %v4378_v48 }
 0x205   : > { %v3437_v50 = vpop.eup %3436 }
 0x206   : > { %3107 = vmatmul.msk.f32.vlgmr.msra.gmra.mxu3 %vm783_vm4, %v3437_v50  ;;  %v1030_v59 = vmul.f32 0.5, %v1022_v20 }
 0x207   : > { %v3439_v51 = vpop.eup %3438  ;;  %3129 = vmatpush.xpose.msk.msra.mxu3 %vm783_vm4, %v4368_v53 }
 0x208   : > { %3098 = vmatmul.msk.f32.vlgmr.msra.gmra.mxu0 %vm783_vm4, %v3439_v51  ;;  %3442 = vtanh.f32 %v1030_v59 }
 0x209   : > { %3120 = vmatpush.xpose.msk.msra.mxu0 %vm783_vm4, %v4390_v1  ;;  %v3441_v62 = vpop.eup %3440 }
 0x20a   : > { %v1013_v60 = vpop.f32.mrf.mxu3  ;;  %3101 = vmatmul.msk.f32.vlgmr.msra.gmra.mxu1 %vm783_vm4, %v3441_v62 }
 0x20b   : > { %v1023_v63 = vadd.f32 %v1013_v60, %v4400_v8  ;;  %3130 = vmatpush.xpose.msk.msra.mxu3 %vm783_vm4, %v4381_v44  ;;  %3123 = vmatpush.xpose.msk.msra.mxu1 %vm783_vm4, %v4406_v0 }
 0x20c   : > { %v926_v57 = vpop.f32.mrf.mxu0 }
 0x20d   : > { %v1020_v54 = vadd.f32 %v926_v57, %v4428_v5  ;;  %3121 = vmatpush.xpose.msk.msra.mxu0 %vm783_vm4, %v4394_v19  ;;  %v1031_v4 = vmul.f32 0.5, %v1023_v63 }
 0x20e   : > { %v3443_v55 = vpop.eup %3442  ;;  %v955_v12 = vpop.f32.mrf.mxu1 }
 0x20f   : > { %v1028_v52 = vmul.f32 0.5, %v1020_v54  ;;  %3444 = vtanh.f32 %v1031_v4  ;;  %3116 = vmatmul.msk.f32.vlgmr.msrb.gmra.mxu2 %vm783_vm4, %v3443_v55  ;;  %v1021_v13 = vadd.f32 %v955_v12, %v4445_v16  ;;  %3124 = vmatpush.xpose.msk.msra.mxu1 %vm783_vm4, %v4417_v9 }
 0x210   : > { %3138 = vmatpush.xpose.msk.msrb.mxu2 %vm783_vm4, %v4403_v10 }
 0x211   : > { %3446 = vtanh.f32 %v1028_v52  ;;  %v1029_v7 = vmul.f32 0.5, %v1021_v13 }
 0x213   : > { %3448 = vtanh.f32 %v1029_v7 }
 0x214   : > { %3139 = vmatpush.xpose.msk.msrb.mxu2 %vm783_vm4, %v4414_v58 }
 0x215   : > { %v3445_v22 = vpop.eup %3444 }
 0x216   : > { %3119 = vmatmul.msk.f32.vlgmr.msrb.gmra.mxu3 %vm783_vm4, %v3445_v22 }
 0x217   : > { %v3447_v23 = vpop.eup %3446  ;;  %3141 = vmatpush.xpose.msk.msrb.mxu3 %vm783_vm4, %v4424_v17 }
 0x218   : > { %3110 = vmatmul.msk.f32.vlgmr.msrb.gmra.mxu0 %vm783_vm4, %v3447_v23 }
 0x219   : > { %3132 = vmatpush.xpose.msk.msrb.mxu0 %vm783_vm4, %v4452_v32  ;;  %v3449_v25 = vpop.eup %3448 }
 0x21a   : > { %3113 = vmatmul.msk.f32.vlgmr.msrb.gmra.mxu1 %vm783_vm4, %v3449_v25 }
 0x21b   : > { %3142 = vmatpush.xpose.msk.msrb.mxu3 %vm783_vm4, %v4439_v29  ;;  %3135 = vmatpush.xpose.msk.msrb.mxu1 %vm783_vm4, %v4468_v11 }
 0x21d   : > { %3133 = vmatpush.xpose.msk.msrb.mxu0 %vm783_vm4, %v4458_v34 }
 0x21f   : > { %3136 = vmatpush.xpose.msk.msrb.mxu1 %vm783_vm4, %v4475_v6 }
 0x281   : > { %v1106_v26 = vpop.f32.mrf.mxu2 }
 0x282   : > { %v1226_v2 = vadd.f32 %v1106_v26, %v4346_v3 }
 0x284   : > { %v1234_v33 = vmul.f32 0.5, %v1226_v2 }
 0x285   : > { %v1060_v27 = vpop.f32.mrf.mxu0 }
 0x286   : > { %v1224_v31 = vadd.f32 %v1060_v27, %v4371_v56  ;;  %3450 = vtanh.f32 %v1234_v33 }
 0x287   : > { %v1083_v28 = vpop.f32.mrf.mxu1 }
 0x288   : > { %v1232_v24 = vmul.f32 0.5, %v1224_v31  ;;  %v1225_v14 = vadd.f32 %v1083_v28, %v4384_v61 }
 0x289   : > { %v1129_v35 = vpop.f32.mrf.mxu3 }
 0x28a   : > { %3452 = vtanh.f32 %v1232_v24  ;;  %v1227_v39 = vadd.f32 %v1129_v35, %v4352_v41  ;;  %v1233_v36 = vmul.f32 0.5, %v1225_v14 }
 0x28c   : > { %v1235_v40 = vmul.f32 0.5, %v1227_v39  ;;  %v3451_v37 = vpop.eup %3450  ;;  %3454 = vtanh.f32 %v1233_v36 }
 0x28d   : > { %3128 = vmatmul.msk.f32.vlgmr.msra.gmra.mxu2 %vm783_vm4, %v3451_v37 }
 0x28e   : > { %3456 = vtanh.f32 %v1235_v40  ;;  %3150 = vmatpush.xpose.msk.msra.mxu2 %vm783_vm4, %v4355_v46 }
 0x290   : > { %v3453_v21 = vpop.eup %3452 }
 0x291   : > { %3122 = vmatmul.msk.f32.vlgmr.msra.gmra.mxu0 %vm783_vm4, %v3453_v21 }
 0x292   : > { %3144 = vmatpush.xpose.msk.msra.mxu0 %vm783_vm4, %v4390_v1  ;;  %v1198_v38 = vpop.f32.mrf.mxu2  ;;  %v3455_v45 = vpop.eup %3454  ;;  %3151 = vmatpush.xpose.msk.msra.mxu2 %vm783_vm4, %v4363_v47 }
 0x293   : > { %v1230_v42 = vadd.f32 %v1198_v38, %v4378_v48  ;;  %3125 = vmatmul.msk.f32.vlgmr.msra.gmra.mxu1 %vm783_vm4, %v3455_v45 }
 0x294   : > { %v3457_v30 = vpop.eup %3456  ;;  %3147 = vmatpush.xpose.msk.msra.mxu1 %vm783_vm4, %v4406_v0 }
 0x295   : > { %v1152_v43 = vpop.f32.mrf.mxu0  ;;  %v1238_v15 = vmul.f32 0.5, %v1230_v42  ;;  %3131 = vmatmul.msk.f32.vlgmr.msra.gmra.mxu3 %vm783_vm4, %v3457_v30 }
 0x296   : > { %v1228_v18 = vadd.f32 %v1152_v43, %v4428_v5  ;;  %3145 = vmatpush.xpose.msk.msra.mxu0 %vm783_vm4, %v4394_v19  ;;  %3153 = vmatpush.xpose.msk.msra.mxu3 %vm783_vm4, %v4368_v53 }
 0x297   : > { %3458 = vtanh.f32 %v1238_v15  ;;  %v1175_v50 = vpop.f32.mrf.mxu1 }
 0x298   : > { %v1236_v49 = vmul.f32 0.5, %v1228_v18  ;;  %v1229_v51 = vadd.f32 %v1175_v50, %v4445_v16  ;;  %3148 = vmatpush.xpose.msk.msra.mxu1 %vm783_vm4, %v4417_v9 }
 0x299   : > { %v1221_v20 = vpop.f32.mrf.mxu3 }
 0x29a   : > { %3460 = vtanh.f32 %v1236_v49  ;;  %v1231_v59 = vadd.f32 %v1221_v20, %v4400_v8  ;;  %3154 = vmatpush.xpose.msk.msra.mxu3 %vm783_vm4, %v4381_v44  ;;  %v1237_v60 = vmul.f32 0.5, %v1229_v51 }
 0x29c   : > { %v1239_v62 = vmul.f32 0.5, %v1231_v59  ;;  %3462 = vtanh.f32 %v1237_v60 }
 0x29d   : > { %v3459_v57 = vpop.eup %3458 }
 0x29e   : > { %3464 = vtanh.f32 %v1239_v62  ;;  %3140 = vmatmul.msk.f32.vlgmr.msrb.gmra.mxu2 %vm783_vm4, %v3459_v57 }
 0x29f   : > { %3162 = vmatpush.xpose.msk.msrb.mxu2 %vm783_vm4, %v4403_v10 }
 0x2a0   : > { %v3461_v63 = vpop.eup %3460 }
 0x2a1   : > { %3134 = vmatmul.msk.f32.vlgmr.msrb.gmra.mxu0 %vm783_vm4, %v3461_v63 }
 0x2a2   : > { %3156 = vmatpush.xpose.msk.msrb.mxu0 %vm783_vm4, %v4452_v32  ;;  %v3463_v54 = vpop.eup %3462 }
 0x2a3   : > { %3163 = vmatpush.xpose.msk.msrb.mxu2 %vm783_vm4, %v4414_v58  ;;  %3137 = vmatmul.msk.f32.vlgmr.msrb.gmra.mxu1 %vm783_vm4, %v3463_v54 }
 0x2a4   : > { %v3465_v4 = vpop.eup %3464  ;;  %3159 = vmatpush.xpose.msk.msrb.mxu1 %vm783_vm4, %v4468_v11 }
 0x2a5   : > { %3143 = vmatmul.msk.f32.vlgmr.msrb.gmra.mxu3 %vm783_vm4, %v3465_v4 }
 0x2a6   : > { %3157 = vmatpush.xpose.msk.msrb.mxu0 %vm783_vm4, %v4458_v34  ;;  %3165 = vmatpush.xpose.msk.msrb.mxu3 %vm783_vm4, %v4424_v17 }
 0x2a8   : > { %3160 = vmatpush.xpose.msk.msrb.mxu1 %vm783_vm4, %v4475_v6 }
 0x2aa   : > { %3166 = vmatpush.xpose.msk.msrb.mxu3 %vm783_vm4, %v4439_v29 }
 0x30e   : > { %v1268_v52 = vpop.f32.mrf.mxu0 }
 0x30f   : > { %v1432_v55 = vadd.f32 %v1268_v52, %v4371_v56 }
 0x310   : > { %v1291_v13 = vpop.f32.mrf.mxu1  ;;  %v1314_v7 = vpop.f32.mrf.mxu2 }
 0x311   : > { %v1440_v12 = vmul.f32 0.5, %v1432_v55  ;;  %v1433_v22 = vadd.f32 %v1291_v13, %v4384_v61  ;;  %v1434_v23 = vadd.f32 %v1314_v7, %v4346_v3 }
 0x313   : > { %3466 = vtanh.f32 %v1440_v12  ;;  %v1441_v25 = vmul.f32 0.5, %v1433_v22  ;;  %v1442_v26 = vmul.f32 0.5, %v1434_v23 }
 0x315   : > { %3468 = vtanh.f32 %v1441_v25 }
 0x316   : > { %3470 = vtanh.f32 %v1442_v26 }
 0x318   : > { %v1337_v27 = vpop.f32.mrf.mxu3 }
 0x319   : > { %v3467_v2 = vpop.eup %3466  ;;  %v1435_v31 = vadd.f32 %v1337_v27, %v4352_v41 }
 0x31a   : > { %3146 = vmatmul.msk.f32.vlgmr.msra.gmra.mxu0 %vm783_vm4, %v3467_v2 }
 0x31b   : > { %3168 = vmatpush.xpose.msk.msra.mxu0 %vm783_vm4, %v4390_v1  ;;  %v1443_v33 = vmul.f32 0.5, %v1435_v31  ;;  %v3469_v24 = vpop.eup %3468 }
 0x31c   : > { %v3471_v35 = vpop.eup %3470  ;;  %3149 = vmatmul.msk.f32.vlgmr.msra.gmra.mxu1 %vm783_vm4, %v3469_v24 }
 0x31d   : > { %3472 = vtanh.f32 %v1443_v33  ;;  %3152 = vmatmul.msk.f32.vlgmr.msra.gmra.mxu2 %vm783_vm4, %v3471_v35  ;;  %3171 = vmatpush.xpose.msk.msra.mxu1 %vm783_vm4, %v4406_v0 }
 0x31e   : > { %v1360_v28 = vpop.f32.mrf.mxu0  ;;  %3174 = vmatpush.xpose.msk.msra.mxu2 %vm783_vm4, %v4355_v46 }
 0x31f   : > { %v1436_v14 = vadd.f32 %v1360_v28, %v4428_v5  ;;  %3169 = vmatpush.xpose.msk.msra.mxu0 %vm783_vm4, %v4394_v19 }
 0x320   : > { %v1383_v36 = vpop.f32.mrf.mxu1 }
 0x321   : > { %v1444_v39 = vmul.f32 0.5, %v1436_v14  ;;  %v1406_v40 = vpop.f32.mrf.mxu2  ;;  %v1437_v37 = vadd.f32 %v1383_v36, %v4445_v16  ;;  %3172 = vmatpush.xpose.msk.msra.mxu1 %vm783_vm4, %v4417_v9 }
 0x322   : > { %v1438_v21 = vadd.f32 %v1406_v40, %v4378_v48  ;;  %3175 = vmatpush.xpose.msk.msra.mxu2 %vm783_vm4, %v4363_v47 }
 0x323   : > { %3474 = vtanh.f32 %v1444_v39  ;;  %v3473_v38 = vpop.eup %3472  ;;  %v1445_v45 = vmul.f32 0.5, %v1437_v37 }
 0x324   : > { %v1446_v42 = vmul.f32 0.5, %v1438_v21  ;;  %3155 = vmatmul.msk.f32.vlgmr.msra.gmra.mxu3 %vm783_vm4, %v3473_v38 }
 0x325   : > { %3177 = vmatpush.xpose.msk.msra.mxu3 %vm783_vm4, %v4368_v53  ;;  %3476 = vtanh.f32 %v1445_v45 }
 0x326   : > { %3478 = vtanh.f32 %v1446_v42 }
 0x328   : > { %v1429_v30 = vpop.f32.mrf.mxu3 }
 0x329   : > { %v3475_v43 = vpop.eup %3474  ;;  %v1439_v18 = vadd.f32 %v1429_v30, %v4400_v8  ;;  %3178 = vmatpush.xpose.msk.msra.mxu3 %vm783_vm4, %v4381_v44 }
 0x32a   : > { %3158 = vmatmul.msk.f32.vlgmr.msrb.gmra.mxu0 %vm783_vm4, %v3475_v43 }
 0x32b   : > { %3180 = vmatpush.xpose.msk.msrb.mxu0 %vm783_vm4, %v4452_v32  ;;  %v1447_v15 = vmul.f32 0.5, %v1439_v18  ;;  %v3477_v49 = vpop.eup %3476 }
 0x32c   : > { %v3479_v50 = vpop.eup %3478  ;;  %3161 = vmatmul.msk.f32.vlgmr.msrb.gmra.mxu1 %vm783_vm4, %v3477_v49 }
 0x32d   : > { %3480 = vtanh.f32 %v1447_v15  ;;  %3164 = vmatmul.msk.f32.vlgmr.msrb.gmra.mxu2 %vm783_vm4, %v3479_v50  ;;  %3183 = vmatpush.xpose.msk.msrb.mxu1 %vm783_vm4, %v4468_v11 }
 0x32e   : > { %3186 = vmatpush.xpose.msk.msrb.mxu2 %vm783_vm4, %v4403_v10 }
 0x32f   : > { %3181 = vmatpush.xpose.msk.msrb.mxu0 %vm783_vm4, %v4458_v34 }
 0x331   : > { %3184 = vmatpush.xpose.msk.msrb.mxu1 %vm783_vm4, %v4475_v6 }
 0x332   : > { %3187 = vmatpush.xpose.msk.msrb.mxu2 %vm783_vm4, %v4414_v58 }
 0x333   : > { %v3481_v20 = vpop.eup %3480 }
 0x334   : > { %3167 = vmatmul.msk.f32.vlgmr.msrb.gmra.mxu3 %vm783_vm4, %v3481_v20 }
 0x335   : > { %3189 = vmatpush.xpose.msk.msrb.mxu3 %vm783_vm4, %v4424_v17 }
 0x339   : > { %3190 = vmatpush.xpose.msk.msrb.mxu3 %vm783_vm4, %v4439_v29 }
 0x397   : > { %v1476_v51 = vpop.f32.mrf.mxu0 }
 0x398   : > { %v1640_v59 = vadd.f32 %v1476_v51, %v4371_v56 }
 0x399   : > { %v1499_v62 = vpop.f32.mrf.mxu1 }
 0x39a   : > { %v1648_v60 = vmul.f32 0.5, %v1640_v59  ;;  %v1641_v57 = vadd.f32 %v1499_v62, %v4384_v61 }
 0x39c   : > { %3482 = vtanh.f32 %v1648_v60  ;;  %v1649_v63 = vmul.f32 0.5, %v1641_v57 }
 0x39e   : > { %3484 = vtanh.f32 %v1649_v63 }
 0x3a0   : > { %v1522_v4 = vpop.f32.mrf.mxu2 }
 0x3a1   : > { %v1642_v52 = vadd.f32 %v1522_v4, %v4346_v3 }
 0x3a2   : > { %v3483_v54 = vpop.eup %3482 }
 0x3a3   : > { %3170 = vmatmul.msk.f32.vlgmr.msra.gmra.mxu0 %vm783_vm4, %v3483_v54  ;;  %v1650_v55 = vmul.f32 0.5, %v1642_v52 }
 0x3a4   : > { %3192 = vmatpush.xpose.msk.msra.mxu0 %vm783_vm4, %v4390_v1  ;;  %v3485_v12 = vpop.eup %3484 }
 0x3a5   : > { %3486 = vtanh.f32 %v1650_v55  ;;  %3173 = vmatmul.msk.f32.vlgmr.msra.gmra.mxu1 %vm783_vm4, %v3485_v12 }
 0x3a6   : > { %3195 = vmatpush.xpose.msk.msra.mxu1 %vm783_vm4, %v4406_v0 }
 0x3a7   : > { %v1568_v13 = vpop.f32.mrf.mxu0  ;;  %v1545_v22 = vpop.f32.mrf.mxu3 }
 0x3a8   : > { %v1644_v7 = vadd.f32 %v1568_v13, %v4428_v5  ;;  %3193 = vmatpush.xpose.msk.msra.mxu0 %vm783_vm4, %v4394_v19  ;;  %v1643_v25 = vadd.f32 %v1545_v22, %v4352_v41 }
 0x3a9   : > { %v1591_v2 = vpop.f32.mrf.mxu1 }
 0x3aa   : > { %v1652_v23 = vmul.f32 0.5, %v1644_v7  ;;  %v1651_v26 = vmul.f32 0.5, %v1643_v25  ;;  %v1645_v27 = vadd.f32 %v1591_v2, %v4445_v16  ;;  %3196 = vmatpush.xpose.msk.msra.mxu1 %vm783_vm4, %v4417_v9 }
 0x3ab   : > { %v3487_v31 = vpop.eup %3486 }
 0x3ac   : > { %3488 = vtanh.f32 %v1652_v23  ;;  %v1653_v33 = vmul.f32 0.5, %v1645_v27  ;;  %3176 = vmatmul.msk.f32.vlgmr.msra.gmra.mxu2 %vm783_vm4, %v3487_v31 }
 0x3ad   : > { %3490 = vtanh.f32 %v1651_v26  ;;  %3198 = vmatpush.xpose.msk.msra.mxu2 %vm783_vm4, %v4355_v46 }
 0x3ae   : > { %3492 = vtanh.f32 %v1653_v33 }
 0x3b0   : > { %v1614_v28 = vpop.f32.mrf.mxu2 }
 0x3b1   : > { %v1646_v14 = vadd.f32 %v1614_v28, %v4378_v48  ;;  %3199 = vmatpush.xpose.msk.msra.mxu2 %vm783_vm4, %v4363_v47 }
 0x3b2   : > { %v3489_v24 = vpop.eup %3488 }
 0x3b3   : > { %3182 = vmatmul.msk.f32.vlgmr.msrb.gmra.mxu0 %vm783_vm4, %v3489_v24  ;;  %v3491_v35 = vpop.eup %3490  ;;  %v1654_v39 = vmul.f32 0.5, %v1646_v14 }
 0x3b4   : > { %3204 = vmatpush.xpose.msk.msrb.mxu0 %vm783_vm4, %v4452_v32  ;;  %3179 = vmatmul.msk.f32.vlgmr.msra.gmra.mxu3 %vm783_vm4, %v3491_v35  ;;  %v3493_v36 = vpop.eup %3492 }
 0x3b5   : > { %3201 = vmatpush.xpose.msk.msra.mxu3 %vm783_vm4, %v4368_v53  ;;  %3494 = vtanh.f32 %v1654_v39  ;;  %3185 = vmatmul.msk.f32.vlgmr.msrb.gmra.mxu1 %vm783_vm4, %v3493_v36 }
 0x3b6   : > { %3207 = vmatpush.xpose.msk.msrb.mxu1 %vm783_vm4, %v4468_v11 }
 0x3b7   : > { %v1637_v40 = vpop.f32.mrf.mxu3 }
 0x3b8   : > { %3205 = vmatpush.xpose.msk.msrb.mxu0 %vm783_vm4, %v4458_v34  ;;  %v1647_v37 = vadd.f32 %v1637_v40, %v4400_v8 }
 0x3b9   : > { %3202 = vmatpush.xpose.msk.msra.mxu3 %vm783_vm4, %v4381_v44 }
 0x3ba   : > { %v1655_v21 = vmul.f32 0.5, %v1647_v37  ;;  %3208 = vmatpush.xpose.msk.msrb.mxu1 %vm783_vm4, %v4475_v6 }
 0x3bb   : > { %v3495_v38 = vpop.eup %3494 }
 0x3bc   : > { %3496 = vtanh.f32 %v1655_v21  ;;  %3188 = vmatmul.msk.f32.vlgmr.msrb.gmra.mxu2 %vm783_vm4, %v3495_v38 }
 0x3bd   : > { %3210 = vmatpush.xpose.msk.msrb.mxu2 %vm783_vm4, %v4403_v10 }
 0x3c1   : > { %3211 = vmatpush.xpose.msk.msrb.mxu2 %vm783_vm4, %v4414_v58 }
 0x3c2   : > { %v3497_v45 = vpop.eup %3496 }
 0x3c3   : > { %3191 = vmatmul.msk.f32.vlgmr.msrb.gmra.mxu3 %vm783_vm4, %v3497_v45 }
 0x3c4   : > { %3213 = vmatpush.xpose.msk.msrb.mxu3 %vm783_vm4, %v4424_v17 }
 0x3c8   : > { %3214 = vmatpush.xpose.msk.msrb.mxu3 %vm783_vm4, %v4439_v29 }
 0x420   : > { %v1684_v42 = vpop.f32.mrf.mxu0 }
 0x421   : > { %v1848_v43 = vadd.f32 %v1684_v42, %v4371_v56 }
 0x422   : > { %v1707_v18 = vpop.f32.mrf.mxu1 }
 0x423   : > { %v1856_v30 = vmul.f32 0.5, %v1848_v43  ;;  %v1849_v15 = vadd.f32 %v1707_v18, %v4384_v61 }
 0x425   : > { %3498 = vtanh.f32 %v1856_v30  ;;  %v1857_v49 = vmul.f32 0.5, %v1849_v15 }
 0x427   : > { %3500 = vtanh.f32 %v1857_v49 }
 0x42b   : > { %v3499_v50 = vpop.eup %3498 }
 0x42c   : > { %3194 = vmatmul.msk.f32.vlgmr.msra.gmra.mxu0 %vm783_vm4, %v3499_v50 }
 0x42d   : > { %3216 = vmatpush.xpose.msk.msra.mxu0 %vm783_vm4, %v4390_v1  ;;  %v3501_v20 = vpop.eup %3500 }
 0x42e   : > { %3197 = vmatmul.msk.f32.vlgmr.msra.gmra.mxu1 %vm783_vm4, %v3501_v20 }
 0x42f   : > { %v1730_v60 = vpop.f32.mrf.mxu2  ;;  %3219 = vmatpush.xpose.msk.msra.mxu1 %vm783_vm4, %v4406_v0 }
 0x430   : > { %v1776_v51 = vpop.f32.mrf.mxu0  ;;  %v1850_v62 = vadd.f32 %v1730_v60, %v4346_v3 }
 0x431   : > { %v1852_v59 = vadd.f32 %v1776_v51, %v4428_v5  ;;  %3217 = vmatpush.xpose.msk.msra.mxu0 %vm783_vm4, %v4394_v19 }
 0x432   : > { %v1858_v63 = vmul.f32 0.5, %v1850_v62  ;;  %v1799_v54 = vpop.f32.mrf.mxu1 }
 0x433   : > { %v1860_v57 = vmul.f32 0.5, %v1852_v59  ;;  %v1853_v4 = vadd.f32 %v1799_v54, %v4445_v16  ;;  %3220 = vmatpush.xpose.msk.msra.mxu1 %vm783_vm4, %v4417_v9 }
 0x435   : > { %3502 = vtanh.f32 %v1860_v57  ;;  %v1861_v52 = vmul.f32 0.5, %v1853_v4 }
 0x436   : > { %3504 = vtanh.f32 %v1858_v63 }
 0x437   : > { %v1753_v55 = vpop.f32.mrf.mxu3  ;;  %3506 = vtanh.f32 %v1861_v52 }
 0x438   : > { %v1851_v12 = vadd.f32 %v1753_v55, %v4352_v41 }
 0x43a   : > { %v1859_v7 = vmul.f32 0.5, %v1851_v12 }
 0x43b   : > { %v3503_v13 = vpop.eup %3502 }
 0x43c   : > { %3206 = vmatmul.msk.f32.vlgmr.msrb.gmra.mxu0 %vm783_vm4, %v3503_v13  ;;  %v3505_v22 = vpop.eup %3504  ;;  %3508 = vtanh.f32 %v1859_v7 }
 0x43d   : > { %3228 = vmatpush.xpose.msk.msrb.mxu0 %vm783_vm4, %v4452_v32  ;;  %3200 = vmatmul.msk.f32.vlgmr.msra.gmra.mxu2 %vm783_vm4, %v3505_v22  ;;  %v3507_v23 = vpop.eup %3506 }
 0x43e   : > { %3222 = vmatpush.xpose.msk.msra.mxu2 %vm783_vm4, %v4355_v46  ;;  %3209 = vmatmul.msk.f32.vlgmr.msrb.gmra.mxu1 %vm783_vm4, %v3507_v23 }
 0x43f   : > { %v1822_v25 = vpop.f32.mrf.mxu2  ;;  %3231 = vmatpush.xpose.msk.msrb.mxu1 %vm783_vm4, %v4468_v11 }
 0x440   : > { %v1854_v2 = vadd.f32 %v1822_v25, %v4378_v48 }
 0x441   : > { %3229 = vmatpush.xpose.msk.msrb.mxu0 %vm783_vm4, %v4458_v34 }
 0x442   : > { %v3509_v26 = vpop.eup %3508  ;;  %3223 = vmatpush.xpose.msk.msra.mxu2 %vm783_vm4, %v4363_v47  ;;  %v1862_v27 = vmul.f32 0.5, %v1854_v2 }
 0x443   : > { %3203 = vmatmul.msk.f32.vlgmr.msra.gmra.mxu3 %vm783_vm4, %v3509_v26  ;;  %3232 = vmatpush.xpose.msk.msrb.mxu1 %vm783_vm4, %v4475_v6 }
 0x444   : > { %3225 = vmatpush.xpose.msk.msra.mxu3 %vm783_vm4, %v4368_v53  ;;  %3510 = vtanh.f32 %v1862_v27 }
 0x446   : > { %v1845_v31 = vpop.f32.mrf.mxu3 }
 0x447   : > { %v1855_v33 = vadd.f32 %v1845_v31, %v4400_v8 }
 0x448   : > { %3226 = vmatpush.xpose.msk.msra.mxu3 %vm783_vm4, %v4381_v44 }
 0x449   : > { %v1863_v24 = vmul.f32 0.5, %v1855_v33 }
 0x44a   : > { %v3511_v28 = vpop.eup %3510 }
 0x44b   : > { %3512 = vtanh.f32 %v1863_v24  ;;  %3212 = vmatmul.msk.f32.vlgmr.msrb.gmra.mxu2 %vm783_vm4, %v3511_v28 }
 0x44c   : > { %3234 = vmatpush.xpose.msk.msrb.mxu2 %vm783_vm4, %v4403_v10 }
 0x450   : > { %3235 = vmatpush.xpose.msk.msrb.mxu2 %vm783_vm4, %v4414_v58 }
 0x451   : > { %v3513_v35 = vpop.eup %3512 }
 0x452   : > { %3215 = vmatmul.msk.f32.vlgmr.msrb.gmra.mxu3 %vm783_vm4, %v3513_v35 }
 0x453   : > { %3237 = vmatpush.xpose.msk.msrb.mxu3 %vm783_vm4, %v4424_v17 }
 0x457   : > { %3238 = vmatpush.xpose.msk.msrb.mxu3 %vm783_vm4, %v4439_v29 }
 0x4a9   : > { %v1892_v14 = vpop.f32.mrf.mxu0 }
 0x4aa   : > { %v2056_v39 = vadd.f32 %v1892_v14, %v4371_v56 }
 0x4ab   : > { %v1915_v40 = vpop.f32.mrf.mxu1 }
 0x4ac   : > { %v2064_v36 = vmul.f32 0.5, %v2056_v39  ;;  %v2057_v37 = vadd.f32 %v1915_v40, %v4384_v61 }
 0x4ae   : > { %3514 = vtanh.f32 %v2064_v36  ;;  %v2065_v21 = vmul.f32 0.5, %v2057_v37  ;;  %v4807_v37 = vld [vmem:[%s3918_s10 + $0x2] sm:$0x1] }
 0x4b0   : > { %3516 = vtanh.f32 %v2065_v21 }
 0x4b4   : > { %v3515_v38 = vpop.eup %3514 }
 0x4b5   : > { %3218 = vmatmul.msk.f32.vlgmr.msra.gmra.mxu0 %vm783_vm4, %v3515_v38 }
 0x4b6   : > { %3240 = vmatpush.xpose.msk.msra.mxu0 %vm783_vm4, %v4390_v1  ;;  %v3517_v45 = vpop.eup %3516 }
 0x4b7   : > { %3221 = vmatmul.msk.f32.vlgmr.msra.gmra.mxu1 %vm783_vm4, %v3517_v45 }
 0x4b8   : > { %3243 = vmatpush.xpose.msk.msra.mxu1 %vm783_vm4, %v4406_v0 }
 0x4b9   : > { %v1984_v42 = vpop.f32.mrf.mxu0 }
 0x4ba   : > { %v2060_v43 = vadd.f32 %v1984_v42, %v4428_v5  ;;  %3241 = vmatpush.xpose.msk.msra.mxu0 %vm783_vm4, %v4394_v19 }
 0x4bb   : > { %v2007_v18 = vpop.f32.mrf.mxu1 }
 0x4bc   : > { %v2068_v30 = vmul.f32 0.5, %v2060_v43  ;;  %v2061_v15 = vadd.f32 %v2007_v18, %v4445_v16  ;;  %3244 = vmatpush.xpose.msk.msra.mxu1 %vm783_vm4, %v4417_v9  ;;  %v4816_v43 = vld [vmem:[%s3918_s10 + $0x3] sm:$0x1] }
 0x4be   : > { %3518 = vtanh.f32 %v2068_v30  ;;  %v2069_v49 = vmul.f32 0.5, %v2061_v15 }
 0x4c0   : > { %v1938_v50 = vpop.f32.mrf.mxu2  ;;  %3520 = vtanh.f32 %v2069_v49 }
 0x4c1   : > { %v2058_v20 = vadd.f32 %v1938_v50, %v4346_v3 }
 0x4c3   : > { %v2066_v59 = vmul.f32 0.5, %v2058_v20 }
 0x4c4   : > { %v3519_v51 = vpop.eup %3518 }
 0x4c5   : > { %3230 = vmatmul.msk.f32.vlgmr.msrb.gmra.mxu0 %vm783_vm4, %v3519_v51  ;;  %3522 = vtanh.f32 %v2066_v59 }
 0x4c6   : > { %3252 = vmatpush.xpose.msk.msrb.mxu0 %vm783_vm4, %v4452_v32  ;;  %v1961_v60 = vpop.f32.mrf.mxu3  ;;  %v3521_v57 = vpop.eup %3520 }
 0x4c7   : > { %v2059_v62 = vadd.f32 %v1961_v60, %v4352_v41  ;;  %3233 = vmatmul.msk.f32.vlgmr.msrb.gmra.mxu1 %vm783_vm4, %v3521_v57 }
 0x4c8   : > { %3255 = vmatpush.xpose.msk.msrb.mxu1 %vm783_vm4, %v4468_v11 }
 0x4c9   : > { %v2067_v63 = vmul.f32 0.5, %v2059_v62 }
 0x4ca   : > { %3253 = vmatpush.xpose.msk.msrb.mxu0 %vm783_vm4, %v4458_v34 }
 0x4cb   : > { %v3523_v3 = vpop.eup %3522  ;;  %3524 = vtanh.f32 %v2067_v63  ;;  %v4844_v63 = vld [vmem:[%s3918_s10] sm:$0x1] }
 0x4cc   : > { %3224 = vmatmul.msk.f32.vlgmr.msra.gmra.mxu2 %vm783_vm4, %v3523_v3  ;;  %3256 = vmatpush.xpose.msk.msrb.mxu1 %vm783_vm4, %v4475_v6 }
 0x4cd   : > { %3246 = vmatpush.xpose.msk.msra.mxu2 %vm783_vm4, %v4355_v46 }
 0x4ce   : > { %v2030_v41 = vpop.f32.mrf.mxu2 }
 0x4cf   : > { %v2062_v4 = vadd.f32 %v2030_v41, %v4378_v48 }
 0x4d1   : > { %v3525_v54 = vpop.eup %3524  ;;  %3247 = vmatpush.xpose.msk.msra.mxu2 %vm783_vm4, %v4363_v47  ;;  %v2070_v52 = vmul.f32 0.5, %v2062_v4  ;;  %v4848_v4 = vld [vmem:[%s3918_s10 + $0x1] sm:$0x1] }
 0x4d2   : > { %3227 = vmatmul.msk.f32.vlgmr.msra.gmra.mxu3 %vm783_vm4, %v3525_v54 }
 0x4d3   : > { %3249 = vmatpush.xpose.msk.msra.mxu3 %vm783_vm4, %v4368_v53  ;;  %3526 = vtanh.f32 %v2070_v52 }
 0x4d5   : > { %v2053_v55 = vpop.f32.mrf.mxu3 }
 0x4d6   : > { %v2063_v12 = vadd.f32 %v2053_v55, %v4400_v8 }
 0x4d7   : > { %3250 = vmatpush.xpose.msk.msra.mxu3 %vm783_vm4, %v4381_v44 }
 0x4d8   : > { %v2071_v13 = vmul.f32 0.5, %v2063_v12 }
 0x4d9   : > { %v3527_v7 = vpop.eup %3526 }
 0x4da   : > { %3528 = vtanh.f32 %v2071_v13  ;;  %3236 = vmatmul.msk.f32.vlgmr.msrb.gmra.mxu2 %vm783_vm4, %v3527_v7 }
 0x4db   : > { %3258 = vmatpush.xpose.msk.msrb.mxu2 %vm783_vm4, %v4403_v10 }
 0x4df   : > { %3259 = vmatpush.xpose.msk.msrb.mxu2 %vm783_vm4, %v4414_v58 }
 0x4e0   : > { %v3529_v22 = vpop.eup %3528 }
 0x4e1   : > { %3239 = vmatmul.msk.f32.vlgmr.msrb.gmra.mxu3 %vm783_vm4, %v3529_v22 }
 0x4e2   : > { %3261 = vmatpush.xpose.msk.msrb.mxu3 %vm783_vm4, %v4424_v17 }
 0x4e6   : > { %3262 = vmatpush.xpose.msk.msrb.mxu3 %vm783_vm4, %v4439_v29 }
 0x532   : > { %v2100_v23 = vpop.f32.mrf.mxu0 }
 0x533   : > { %v2264_v25 = vadd.f32 %v2100_v23, %v4371_v56 }
 0x534   : > { %v2123_v2 = vpop.f32.mrf.mxu1 }
 0x535   : > { %v2272_v26 = vmul.f32 0.5, %v2264_v25  ;;  %v2265_v27 = vadd.f32 %v2123_v2, %v4384_v61 }
 0x537   : > { %3530 = vtanh.f32 %v2272_v26  ;;  %v2273_v31 = vmul.f32 0.5, %v2265_v27 }
 0x539   : > { %3532 = vtanh.f32 %v2273_v31 }
 0x53d   : > { %v3531_v33 = vpop.eup %3530 }
 0x53e   : > { %3242 = vmatmul.msk.f32.vlgmr.msra.gmra.mxu0 %vm783_vm4, %v3531_v33  ;;  %v4879_v33 = vld [vmem:[%s3918_s10 + $0x6] sm:$0x1] }
 0x53f   : > { %3264 = vmatpush.xpose.msk.msra.mxu0 %vm783_vm4, %v4390_v1  ;;  %v3533_v24 = vpop.eup %3532 }
 0x540   : > { %3245 = vmatmul.msk.f32.vlgmr.msra.gmra.mxu1 %vm783_vm4, %v3533_v24 }
 0x541   : > { %3267 = vmatpush.xpose.msk.msra.mxu1 %vm783_vm4, %v4406_v0 }
 0x542   : > { %v2192_v28 = vpop.f32.mrf.mxu0 }
 0x543   : > { %v2268_v35 = vadd.f32 %v2192_v28, %v4428_v5  ;;  %3265 = vmatpush.xpose.msk.msra.mxu0 %vm783_vm4, %v4394_v19 }
 0x544   : > { %v2215_v61 = vpop.f32.mrf.mxu1 }
 0x545   : > { %v2276_v56 = vmul.f32 0.5, %v2268_v35  ;;  %v2269_v14 = vadd.f32 %v2215_v61, %v4445_v16  ;;  %3268 = vmatpush.xpose.msk.msra.mxu1 %vm783_vm4, %v4417_v9  ;;  %v4888_v35 = vld [vmem:[%s3918_s10 + $0x7] sm:$0x1] }
 0x547   : > { %3534 = vtanh.f32 %v2276_v56  ;;  %v2277_v39 = vmul.f32 0.5, %v2269_v14 }
 0x549   : > { %3536 = vtanh.f32 %v2277_v39 }
 0x54d   : > { %v3535_v36 = vpop.eup %3534 }
 0x54e   : > { %3254 = vmatmul.msk.f32.vlgmr.msrb.gmra.mxu0 %vm783_vm4, %v3535_v36 }
 0x54f   : > { %3276 = vmatpush.xpose.msk.msrb.mxu0 %vm783_vm4, %v4452_v32  ;;  %v2146_v40 = vpop.f32.mrf.mxu2  ;;  %v3537_v38 = vpop.eup %3536 }
 0x550   : > { %v2266_v21 = vadd.f32 %v4807_v37, %v2146_v40  ;;  %3257 = vmatmul.msk.f32.vlgmr.msrb.gmra.mxu1 %vm783_vm4, %v3537_v38 }
 0x551   : > { %3279 = vmatpush.xpose.msk.msrb.mxu1 %vm783_vm4, %v4468_v11 }
 0x552   : > { %v2274_v45 = vmul.f32 0.5, %v2266_v21 }
 0x553   : > { %3277 = vmatpush.xpose.msk.msrb.mxu0 %vm783_vm4, %v4458_v34 }
 0x554   : > { %3538 = vtanh.f32 %v2274_v45  ;;  %v3585_v45 = vld [vmem:[%s3918_s10 + $0x5] sm:$0x1] }
 0x555   : > { %v2169_v42 = vpop.f32.mrf.mxu3  ;;  %3280 = vmatpush.xpose.msk.msrb.mxu1 %vm783_vm4, %v4475_v6 }
 0x556   : > { %v2267_v30 = vadd.f32 %v4816_v43, %v2169_v42 }
 0x558   : > { %v2275_v18 = vmul.f32 0.5, %v2267_v30 }
 0x55a   : > { %v3539_v15 = vpop.eup %3538  ;;  %3540 = vtanh.f32 %v2275_v18 }
 0x55b   : > { %3248 = vmatmul.msk.f32.vlgmr.msra.gmra.mxu2 %vm783_vm4, %v3539_v15 }
 0x55c   : > { %3270 = vmatpush.xpose.msk.msra.mxu2 %vm783_vm4, %v4355_v46 }
 0x55d   : > { %v2238_v49 = vpop.f32.mrf.mxu2 }
 0x55e   : > { %v2270_v20 = vadd.f32 %v2238_v49, %v4378_v48 }
 0x560   : > { %v3541_v50 = vpop.eup %3540  ;;  %3271 = vmatpush.xpose.msk.msra.mxu2 %vm783_vm4, %v4363_v47  ;;  %v2278_v51 = vmul.f32 0.5, %v2270_v20 }
 0x561   : > { %3251 = vmatmul.msk.f32.vlgmr.msra.gmra.mxu3 %vm783_vm4, %v3541_v50 }
 0x562   : > { %3273 = vmatpush.xpose.msk.msra.mxu3 %vm783_vm4, %v4368_v53  ;;  %3542 = vtanh.f32 %v2278_v51 }
 0x564   : > { %v2261_v59 = vpop.f32.mrf.mxu3 }
 0x565   : > { %v2271_v60 = vadd.f32 %v2261_v59, %v4400_v8 }
 0x566   : > { %3274 = vmatpush.xpose.msk.msra.mxu3 %vm783_vm4, %v4381_v44 }
 0x567   : > { %v2279_v62 = vmul.f32 0.5, %v2271_v60 }
 0x568   : > { %v3543_v48 = vpop.eup %3542 }
 0x569   : > { %3544 = vtanh.f32 %v2279_v62  ;;  %3260 = vmatmul.msk.f32.vlgmr.msrb.gmra.mxu2 %vm783_vm4, %v3543_v48 }
 0x56a   : > { %3282 = vmatpush.xpose.msk.msrb.mxu2 %vm783_vm4, %v4403_v10 }
 0x56e   : > { %3283 = vmatpush.xpose.msk.msrb.mxu2 %vm783_vm4, %v4414_v58 }
 0x56f   : > { %v3545_v57 = vpop.eup %3544 }
 0x570   : > { %3263 = vmatmul.msk.f32.vlgmr.msrb.gmra.mxu3 %vm783_vm4, %v3545_v57 }
 0x571   : > { %3285 = vmatpush.xpose.msk.msrb.mxu3 %vm783_vm4, %v4424_v17 }
 0x575   : > { %3286 = vmatpush.xpose.msk.msrb.mxu3 %vm783_vm4, %v4439_v29 }
 0x5bb   : > { %v2308_v8 = vpop.f32.mrf.mxu0 }
 0x5bc   : > { %v2472_v3 = vadd.f32 %v4844_v63, %v2308_v8 }
 0x5bd   : > { %v2331_v54 = vpop.f32.mrf.mxu1 }
 0x5be   : > { %v2480_v41 = vmul.f32 0.5, %v2472_v3  ;;  %v2473_v52 = vadd.f32 %v4848_v4, %v2331_v54 }
 0x5c0   : > { %3546 = vtanh.f32 %v2480_v41  ;;  %v2481_v55 = vmul.f32 0.5, %v2473_v52 }
 0x5c2   : > { %3548 = vtanh.f32 %v2481_v55 }
 0x5c6   : > { %v3547_v12 = vpop.eup %3546 }
 0x5c7   : > { %3266 = vmatmul.msk.f32.vlgmr.msra.gmra.mxu0 %vm783_vm4, %v3547_v12 }
 0x5c8   : > { %3288 = vmatpush.xpose.msk.msra.mxu0 %vm783_vm4, %v4390_v1  ;;  %v3549_v13 = vpop.eup %3548 }
 0x5c9   : > { %3269 = vmatmul.msk.f32.vlgmr.msra.gmra.mxu1 %vm783_vm4, %v3549_v13 }
 0x5ca   : > { %3291 = vmatpush.xpose.msk.msra.mxu1 %vm783_vm4, %v4406_v0 }
 0x5cb   : > { %v2400_v7 = vpop.f32.mrf.mxu0 }
 0x5cc   : > { %v2476_v22 = vadd.f32 %v2400_v7, %v4428_v5  ;;  %3289 = vmatpush.xpose.msk.msra.mxu0 %vm783_vm4, %v4394_v19 }
 0x5cd   : > { %v2423_v25 = vpop.f32.mrf.mxu1 }
 0x5ce   : > { %v2484_v23 = vmul.f32 0.5, %v2476_v22  ;;  %v2477_v26 = vadd.f32 %v2423_v25, %v4445_v16  ;;  %3292 = vmatpush.xpose.msk.msra.mxu1 %vm783_vm4, %v4417_v9 }
 0x5d0   : > { %3550 = vtanh.f32 %v2484_v23  ;;  %v2485_v1 = vmul.f32 0.5, %v2477_v26 }
 0x5d2   : > { %3552 = vtanh.f32 %v2485_v1 }
 0x5d6   : > { %v3551_v2 = vpop.eup %3550 }
 0x5d7   : > { %3278 = vmatmul.msk.f32.vlgmr.msrb.gmra.mxu0 %vm783_vm4, %v3551_v2 }
 0x5d8   : > { %3300 = vmatpush.xpose.msk.msrb.mxu0 %vm783_vm4, %v4452_v32  ;;  %v3553_v19 = vpop.eup %3552 }
 0x5d9   : > { %3281 = vmatmul.msk.f32.vlgmr.msrb.gmra.mxu1 %vm783_vm4, %v3553_v19 }
 0x5da   : > { %3303 = vmatpush.xpose.msk.msrb.mxu1 %vm783_vm4, %v4468_v11 }
 0x5dc   : > { %3301 = vmatpush.xpose.msk.msrb.mxu0 %vm783_vm4, %v4458_v34 }
 0x5de   : > { %v2354_v0 = vpop.f32.mrf.mxu2  ;;  %3304 = vmatpush.xpose.msk.msrb.mxu1 %vm783_vm4, %v4475_v6 }
 0x5df   : > { %v2474_v9 = vadd.f32 %v4807_v37, %v2354_v0 }
 0x5e1   : > { %v2482_v5 = vmul.f32 0.5, %v2474_v9 }
 0x5e3   : > { %3554 = vtanh.f32 %v2482_v5 }
 0x5e4   : > { %v2377_v16 = vpop.f32.mrf.mxu3 }
 0x5e5   : > { %v2475_v32 = vadd.f32 %v4816_v43, %v2377_v16 }
 0x5e7   : > { %v2483_v27 = vmul.f32 0.5, %v2475_v32 }
 0x5e9   : > { %v3555_v31 = vpop.eup %3554  ;;  %3556 = vtanh.f32 %v2483_v27 }
 0x5ea   : > { %3272 = vmatmul.msk.f32.vlgmr.msra.gmra.mxu2 %vm783_vm4, %v3555_v31 }
 0x5eb   : > { %3294 = vmatpush.xpose.msk.msra.mxu2 %vm783_vm4, %v4355_v46 }
 0x5ec   : > { %v2446_v34 = vpop.f32.mrf.mxu2 }
 0x5ed   : > { %v2478_v6 = vadd.f32 %v4879_v33, %v2446_v34 }
 0x5ef   : > { %v3557_v11 = vpop.eup %3556  ;;  %3295 = vmatpush.xpose.msk.msra.mxu2 %vm783_vm4, %v4363_v47  ;;  %v2486_v24 = vmul.f32 0.5, %v2478_v6 }
 0x5f0   : > { %3275 = vmatmul.msk.f32.vlgmr.msra.gmra.mxu3 %vm783_vm4, %v3557_v11 }
 0x5f1   : > { %3297 = vmatpush.xpose.msk.msra.mxu3 %vm783_vm4, %v4368_v53  ;;  %3558 = vtanh.f32 %v2486_v24 }
 0x5f3   : > { %v2469_v28 = vpop.f32.mrf.mxu3 }
 0x5f4   : > { %v2479_v46 = vadd.f32 %v4888_v35, %v2469_v28 }
 0x5f5   : > { %3298 = vmatpush.xpose.msk.msra.mxu3 %vm783_vm4, %v4381_v44 }
 0x5f6   : > { %v2487_v56 = vmul.f32 0.5, %v2479_v46 }
 0x5f7   : > { %v3559_v61 = vpop.eup %3558 }
 0x5f8   : > { %3560 = vtanh.f32 %v2487_v56  ;;  %3284 = vmatmul.msk.f32.vlgmr.msrb.gmra.mxu2 %vm783_vm4, %v3559_v61 }
 0x5f9   : > { %3306 = vmatpush.xpose.msk.msrb.mxu2 %vm783_vm4, %v4403_v10 }
 0x5fd   : > { %3307 = vmatpush.xpose.msk.msrb.mxu2 %vm783_vm4, %v4414_v58 }
 0x5fe   : > { %v3561_v47 = vpop.eup %3560 }
 0x5ff   : > { %3287 = vmatmul.msk.f32.vlgmr.msrb.gmra.mxu3 %vm783_vm4, %v3561_v47 }
 0x600   : > { %3309 = vmatpush.xpose.msk.msrb.mxu3 %vm783_vm4, %v4424_v17 }
 0x604   : > { %3310 = vmatpush.xpose.msk.msrb.mxu3 %vm783_vm4, %v4439_v29  ;;  %v3584_v29 = vld [vmem:[%s3918_s10 + $0x4] sm:$0x1] }
 0x644   : > { %v2516_v53 = vpop.f32.mrf.mxu0 }
 0x645   : > { %v2680_v14 = vadd.f32 %v4844_v63, %v2516_v53 }
 0x646   : > { %v2539_v44 = vpop.f32.mrf.mxu1 }
 0x647   : > { %v2681_v10 = vadd.f32 %v4848_v4, %v2539_v44  ;;  %v2688_v39 = vmul.f32 0.5, %v2680_v14 }
 0x649   : > { %v2689_v36 = vmul.f32 0.5, %v2681_v10  ;;  %3562 = vtanh.f32 %v2688_v39 }
 0x64b   : > { %3564 = vtanh.f32 %v2689_v36 }
 0x64f   : > { %v3563_v58 = vpop.eup %3562 }
 0x650   : > { %3290 = vmatmul.msk.f32.vlgmr.msra.gmra.mxu0 %vm783_vm4, %v3563_v58 }
 0x651   : > { %v3565_v40 = vpop.eup %3564 }
 0x652   : > { %3293 = vmatmul.msk.f32.vlgmr.msra.gmra.mxu1 %vm783_vm4, %v3565_v40 }
 0x654   : > { %v2608_v17 = vpop.f32.mrf.mxu0 }
 0x655   : > { %v2684_v38 = vadd.f32 %v3584_v29, %v2608_v17 }
 0x656   : > { %v2631_v21 = vpop.f32.mrf.mxu1 }
 0x657   : > { %v2685_v42 = vadd.f32 %v3585_v45, %v2631_v21  ;;  %v2692_v30 = vmul.f32 0.5, %v2684_v38 }
 0x659   : > { %v2693_v18 = vmul.f32 0.5, %v2685_v42  ;;  %3566 = vtanh.f32 %v2692_v30 }
 0x65b   : > { %3568 = vtanh.f32 %v2693_v18 }
 0x65f   : > { %v3567_v20 = vpop.eup %3566 }
 0x660   : > { %3302 = vmatmul.msk.f32.vlgmr.msrb.gmra.mxu0 %vm783_vm4, %v3567_v20 }
 0x661   : > { %v3569_v59 = vpop.eup %3568 }
 0x662   : > { %3305 = vmatmul.msk.f32.vlgmr.msrb.gmra.mxu1 %vm783_vm4, %v3569_v59 }
 0x66d   : > { %v2562_v15 = vpop.f32.mrf.mxu2 }
 0x66e   : > { %v2682_v49 = vadd.f32 %v4807_v37, %v2562_v15 }
 0x670   : > { %v2690_v50 = vmul.f32 0.5, %v2682_v49 }
 0x672   : > { %3570 = vtanh.f32 %v2690_v50 }
 0x673   : > { %v2585_v51 = vpop.f32.mrf.mxu3 }
 0x674   : > { %v2683_v60 = vadd.f32 %v4816_v43, %v2585_v51 }
 0x676   : > { %v2691_v62 = vmul.f32 0.5, %v2683_v60 }
 0x678   : > { %v3571_v48 = vpop.eup %3570  ;;  %3572 = vtanh.f32 %v2691_v62 }
 0x679   : > { %3296 = vmatmul.msk.f32.vlgmr.msra.gmra.mxu2 %vm783_vm4, %v3571_v48 }
 0x67b   : > { %v2654_v57 = vpop.f32.mrf.mxu2 }
 0x67c   : > { %v2686_v3 = vadd.f32 %v4879_v33, %v2654_v57 }
 0x67e   : > { %v3573_v8 = vpop.eup %3572  ;;  %v2694_v41 = vmul.f32 0.5, %v2686_v3 }
 0x67f   : > { %3299 = vmatmul.msk.f32.vlgmr.msra.gmra.mxu3 %vm783_vm4, %v3573_v8 }
 0x680   : > { %3574 = vtanh.f32 %v2694_v41 }
 0x682   : > { %v2677_v54 = vpop.f32.mrf.mxu3 }
 0x683   : > { %v2687_v52 = vadd.f32 %v4888_v35, %v2677_v54 }
 0x685   : > { %v2695_v55 = vmul.f32 0.5, %v2687_v52 }
 0x686   : > { %v3575_v12 = vpop.eup %3574 }
 0x687   : > { %3576 = vtanh.f32 %v2695_v55  ;;  %3308 = vmatmul.msk.f32.vlgmr.msrb.gmra.mxu2 %vm783_vm4, %v3575_v12 }
 0x68d   : > { %v3577_v13 = vpop.eup %3576 }
 0x68e   : > { %3311 = vmatmul.msk.f32.vlgmr.msrb.gmra.mxu3 %vm783_vm4, %v3577_v13 }
 0x6cd   : > { %v2724_v7 = vpop.f32.mrf.mxu0 }
 0x6ce   : > { %v2888_v22 = vadd.f32 %v4844_v63, %v2724_v7 }
 0x6cf   : > { %v2747_v23 = vpop.f32.mrf.mxu1 }
 0x6d0   : > { %v2889_v25 = vadd.f32 %v4848_v4, %v2747_v23  ;;  %2897 = vst.msk [vmem:[%s248_s18] sm:$0x1] %vm2896_vm0, %v2888_v22 }
 0x6d2   : > { %2898 = vst.msk [vmem:[%s248_s18 + $0x1] sm:$0x1] %vm2896_vm0, %v2889_v25 }
 0x6dd   : > { %v2816_v26 = vpop.f32.mrf.mxu0 }
 0x6de   : > { %v2892_v1 = vadd.f32 %v3584_v29, %v2816_v26 }
 0x6df   : > { %v2839_v2 = vpop.f32.mrf.mxu1 }
 0x6e0   : > { %v2893_v19 = vadd.f32 %v3585_v45, %v2839_v2  ;;  %2901 = vst.msk [vmem:[%s248_s18 + $0x4] sm:$0x1] %vm2896_vm0, %v2892_v1 }
 0x6e2   : > { %2902 = vst.msk [vmem:[%s248_s18 + $0x5] sm:$0x1] %vm2896_vm0, %v2893_v19 }
 0x6fc   : > { %v2770_v0 = vpop.f32.mrf.mxu2 }
 0x6fd   : > { %v2890_v63 = vadd.f32 %v4807_v37, %v2770_v0 }
 0x6ff   : > { %2899 = vst.msk [vmem:[%s248_s18 + $0x2] sm:$0x1] %vm2896_vm0, %v2890_v63 }
 0x702   : > { %v2793_v4 = vpop.f32.mrf.mxu3 }
 0x703   : > { %v2891_v9 = vadd.f32 %v4816_v43, %v2793_v4 }
 0x705   : > { %2900 = vst.msk [vmem:[%s248_s18 + $0x3] sm:$0x1] %vm2896_vm0, %v2891_v9 }
 0x70a   : > { %v2862_v5 = vpop.f32.mrf.mxu2 }
 0x70b   : > { %v2894_v16 = vadd.f32 %v4879_v33, %v2862_v5 }
 0x70d   : > { %2903 = vst.msk [vmem:[%s248_s18 + $0x6] sm:$0x1] %vm2896_vm0, %v2894_v16 }
 0x711   : > { %v2885_v37 = vpop.f32.mrf.mxu3 }
 0x712   : > { %v2895_v43 = vadd.f32 %v4888_v35, %v2885_v37 }
 0x714   : > { %2904 = vst.msk [vmem:[%s248_s18 + $0x7] sm:$0x1] %vm2896_vm0, %v2895_v43 }
 0x715   : > { %3703 = shalt.err (!%p3700_p9)
}
 0x716   : > { %s3757_s29 = smov 16   ;;  %s3758_s8 = smov 1  }
 0x717   : > { %3326 = dma.vmem_to_hbm [thread:$0]  (%p3849_p7), %s2918_s28, 128, %s2920_s17, %s2906_s16, %s3757_s29, %s3757_s29, %s3758_s8  }
 0x718 PF: > { %s2934_s23 = sand.u32 1, %s3738_s12   ;;  %p5004_p12 = scmp.ge.s32.totalorder %s3750_s15, 2 }
 0x719   : > { %s2935_s22 = scalar_lea.sflag [#allocation4], %s2934_s23 }
 0x71a   : > { %p3340_p13 = pnand %p5004_p12, %p3814_p6 }
 0x71c   : > { %p3341_p0 = pneg %p3340_p13 }
 0x71e   : > { %3733 = dma.done.wait (%p3341_p0), %s2935_s22, 128  }
 0x71f   : > { %3735 = vsyncadd (%p3341_p0), %s2935_s22, 4294967168  ;;  %s5005_s7 = sld [smem:[#allocation13_spill]]  ;;  %p19_p3 = scmp.ge.s32.totalorder %s3832_s26, 4  }
 0x720   : > { %s5006_s12 = smov %s3742_s13  ;;  %s5007_s13 = smov %s3746_s14 }
 0x721   : > { %s5009_s15 = smov %s3832_s26  ;;  %21 = sbr.rel (!%p19_p3) target bundleno = 9 (0x9), region = 94 }
 0x725   : > { %s5008_s14 = smov %s5005_s7 }
 0x726   :  { %2941 = vsyncpa [#allocation3], 1 }
 0x727   :  { %2943 = vsyncpa [#allocation3 + $0x1], 1 }
 0x728   :  { %2944 = vsyncpa [#allocation6], 1 }
 0x729   :  { %2946 = vsyncpa [#allocation6 + $0x1], 1 }
 0x72a   :  { %2947 = vsyncpa [#allocation4], 1 }
 0x72b   :  { %2949 = vsyncpa [#allocation4 + $0x1], 1 }

</bundles_post_ra>
